<compile_context>
chip_gen: v7x
topology: tpu7x:2x2x1
jax: 0.10.0
libtpu: 0.0.40
codegen_flags: <defaults>
</compile_context>

<pallas_src>
import jax
import jax.numpy as jnp
from jax import lax
from jax.experimental import pallas as pl
from jax.experimental.pallas import tpu as pltpu


_KEY_SHIFT = 16     # token ids must lie in [0, 2**16)
_ROW_GROUP = 8      # rows (sublanes) processed per inner iteration
_C_CHUNK = 8        # compacted positions compared per inner iteration


def _round_up(x: int, m: int) -> int:
    return (x + m - 1) // m * m


def _make_lnr_kernel(blank: int):
    rg = _ROW_GROUP
    cc = _C_CHUNK

    def kernel(targets_ref, preds_ref, out_c_ref, out_l_ref):
        nb, t = targets_ref.shape          # block: (NB, T); NB % rg == 0, T % cc == 0

        # ---- hoisted constants (shared by every row group / chunk) ----------
        lane = lax.broadcasted_iota(jnp.int32, (rg, t), 1)     # column index j
        # Selection masks for a zero-filled "shift right by d" built from two
        # rolls of the index vector, so the scan is correct regardless of the
        # hardware rotate-direction convention.  Rolls run on the (idle) XLU.
        sels = []
        d = 1
        while d < t:
            want = lane - d
            sels.append((d,
                         pltpu.roll(lane, d, 1) == want,
                         pltpu.roll(lane, t - d, 1) == want))
            d *= 2
        c_hi = lax.broadcasted_iota(jnp.int32, (rg, cc), 1) << _KEY_SHIFT

        corrects = jnp.int32(0)
        lengths = jnp.int32(0)

        # ---- statically unrolled loops over 8-row groups and c-chunks -------
        for r0 in range(0, nb, rg):
            tgt = targets_ref[r0:r0 + rg, :]                    # (rg, t) int32
            nb_mask = tgt != blank
            mask_i = nb_mask.astype(jnp.int32)
            lengths = lengths + jnp.sum(mask_i)

            # Inclusive prefix sum of mask_i along T (Hillis-Steele scan).
            run = mask_i
            for d, sel_a, sel_b in sels:
                a = pltpu.roll(run, d, 1)
                b = pltpu.roll(run, t - d, 1)
                run = run + jnp.where(sel_a, a, jnp.where(sel_b, b, 0))
            cidx = run - 1                    # compacted position of each non-blank

            # Key-encode the targets: fuses (compacted position, token) in one i32.
            key_t = jnp.where(nb_mask, (cidx << _KEY_SHIFT) | tgt, -1)   # (rg, t)
            key_t3 = key_t[:, None, :]                                   # (rg, 1, t)

            # Compare against preds `cc` compacted positions at a time.
            for c0 in range(0, t, cc):
                p_chunk = preds_ref[r0:r0 + rg, c0:c0 + cc]              # (rg, cc)
                key_p = (c_hi + (c0 << _KEY_SHIFT)) | p_chunk            # (rg, cc)
                match = key_t3 == key_p[:, :, None]                      # (rg, cc, t)
                corrects = corrects + jnp.sum(match.astype(jnp.int32))

        # Lane-aligned (8, 128) int32 partials; the wrapper sums over the grid.
        out_c_ref[...] = jnp.zeros(out_c_ref.shape, jnp.int32) + corrects
        out_l_ref[...] = jnp.zeros(out_l_ref.shape, jnp.int32) + lengths

    return kernel


def letter_number_recognition_rate(preds, targets, blank: int = 0):
    """preds, targets: (N, T) int token ids. Returns scalar float32 rate."""
    preds = jnp.asarray(preds, dtype=jnp.int32)
    targets = jnp.asarray(targets, dtype=jnp.int32)
    if targets.ndim != 2 or preds.ndim != 2:
        raise ValueError("Expected 2D (N, T) tensors.")
    n, t = targets.shape

    # Pad T to a lane multiple and N to a sublane multiple; pad value = blank,
    # so padded rows/columns contribute 0 to both corrects and lengths.
    t_pad = _round_up(max(t, 1), 128)
    nb = min(_round_up(max(n, 1), _ROW_GROUP), 64)      # rows per grid block
    n_pad = _round_up(max(n, 1), nb)
    grid = n_pad // nb

    tgt_p = jnp.full((n_pad, t_pad), blank, jnp.int32).at[:n, :t].set(targets)
    prd_p = jnp.full((n_pad, t_pad), blank, jnp.int32).at[:n, :t].set(preds)

    out_c, out_l = pl.pallas_call(
        _make_lnr_kernel(blank),
        out_shape=(jax.ShapeDtypeStruct((grid, 8, 128), jnp.int32),
                   jax.ShapeDtypeStruct((grid, 8, 128), jnp.int32)),
        grid=(grid,),
        in_specs=[pl.BlockSpec((nb, t_pad), lambda i: (i, 0)),
                  pl.BlockSpec((nb, t_pad), lambda i: (i, 0))],
        out_specs=(pl.BlockSpec((1, 8, 128), lambda i: (i, 0, 0)),
                   pl.BlockSpec((1, 8, 128), lambda i: (i, 0, 0))),
        compiler_params=pltpu.CompilerParams(
            dimension_semantics=("parallel",),        # grid blocks are independent
            vmem_limit_bytes=32 * 1024 * 1024),
    )(tgt_p, prd_p)

    corrects = jnp.sum(out_c[:, 0, 0])
    lengths = jnp.sum(out_l[:, 0, 0])
    # NOTE: the PyTorch reference raises ZeroDivisionError when every target
    # token is blank; here that case yields inf/nan instead.
    return corrects.astype(jnp.float32) / lengths.astype(jnp.float32)


def _reference_rate(preds, targets, blank=0):
    # Pure-Python mirror of the PyTorch forward.
    preds = [list(map(int, row)) for row in preds]
    targets = [list(map(int, row)) for row in targets]
    aligned = [[t for t in seq if t != blank] for seq in targets]
    corrects = 0
    lengths = 0
    for p_seq, t_seq in zip(preds, aligned):
        for p, t in zip(p_seq, t_seq):
            if p == t:
                corrects += 1
        lengths += len(t_seq)
    return corrects / lengths


if __name__ == "__main__":
    N, T = 2, 8
    vocab = 12
    blank = 0

    key = jax.random.PRNGKey(0)
    k1, k2 = jax.random.split(key)
    targets = jax.random.randint(k1, (N, T), 0, vocab, dtype=jnp.int32)
    preds = jax.random.randint(k2, (N, T), 0, vocab, dtype=jnp.int32)
    # guarantee at least one non-blank target token (non-zero denominator)
    targets = targets.at[:, 0].set(3)
    # guarantee at least one correct recognition
    preds = preds.at[0, 0].set(3)

    rate = letter_number_recognition_rate(preds, targets, blank=blank)
    rate = jax.block_until_ready(rate)

    expected = _reference_rate(jax.device_get(preds), jax.device_get(targets), blank=blank)
    assert abs(float(rate) - expected) < 1e-6, (float(rate), expected)

    print("KERNEL_OK")
</pallas_src>

<mosaic_0001>
module attributes {stable_mosaic.version = 11 : i64} {
  func.func @kernel(%arg0: i32, %arg1: memref<8x128xi32, #tpu.memory_space<vmem>>, %arg2: memref<8x128xi32, #tpu.memory_space<vmem>>, %arg3: memref<1x8x128xi32, #tpu.memory_space<vmem>>, %arg4: memref<1x8x128xi32, #tpu.memory_space<vmem>>) attributes {dimension_semantics = [#tpu.dimension_semantics<parallel>], iteration_bounds = array<i64: 1>, scalar_prefetch = 0 : i64, scratch_operands = 0 : i64, tpu.core_type = #tpu.core_type<tc>, window_params = [{transform_indices = @transform_0, window_bounds = array<i64: 8, 128>}, {transform_indices = @transform_1, window_bounds = array<i64: 8, 128>}, {transform_indices = @transform_2, window_bounds = array<i64: 1, 8, 128>}, {transform_indices = @transform_3, window_bounds = array<i64: 1, 8, 128>}]} {
    %0 = tpu.iota {dimensions = array<i32: 1>} : vector<8x128xi32>
    %c1_i32 = arith.constant 1 : i32
    %1 = vector.broadcast %c1_i32 : i32 to vector<8x128xi32>
    %2 = arith.subi %0, %1 : vector<8x128xi32>
    %c1_i32_0 = arith.constant 1 : i32
    %3 = tpu.dynamic_rotate %0 by %c1_i32_0 dim 1 : vector<8x128xi32>, i32 -> vector<8x128xi32>
    %4 = arith.cmpi eq, %3, %2 : vector<8x128xi32>
    %c127_i32 = arith.constant 127 : i32
    %5 = tpu.dynamic_rotate %0 by %c127_i32 dim 1 : vector<8x128xi32>, i32 -> vector<8x128xi32>
    %6 = arith.cmpi eq, %5, %2 : vector<8x128xi32>
    %c2_i32 = arith.constant 2 : i32
    %7 = vector.broadcast %c2_i32 : i32 to vector<8x128xi32>
    %8 = arith.subi %0, %7 : vector<8x128xi32>
    %c2_i32_1 = arith.constant 2 : i32
    %9 = tpu.dynamic_rotate %0 by %c2_i32_1 dim 1 : vector<8x128xi32>, i32 -> vector<8x128xi32>
    %10 = arith.cmpi eq, %9, %8 : vector<8x128xi32>
    %c126_i32 = arith.constant 126 : i32
    %11 = tpu.dynamic_rotate %0 by %c126_i32 dim 1 : vector<8x128xi32>, i32 -> vector<8x128xi32>
    %12 = arith.cmpi eq, %11, %8 : vector<8x128xi32>
    %c4_i32 = arith.constant 4 : i32
    %13 = vector.broadcast %c4_i32 : i32 to vector<8x128xi32>
    %14 = arith.subi %0, %13 : vector<8x128xi32>
    %c4_i32_2 = arith.constant 4 : i32
    %15 = tpu.dynamic_rotate %0 by %c4_i32_2 dim 1 : vector<8x128xi32>, i32 -> vector<8x128xi32>
    %16 = arith.cmpi eq, %15, %14 : vector<8x128xi32>
    %c124_i32 = arith.constant 124 : i32
    %17 = tpu.dynamic_rotate %0 by %c124_i32 dim 1 : vector<8x128xi32>, i32 -> vector<8x128xi32>
    %18 = arith.cmpi eq, %17, %14 : vector<8x128xi32>
    %c8_i32 = arith.constant 8 : i32
    %19 = vector.broadcast %c8_i32 : i32 to vector<8x128xi32>
    %20 = arith.subi %0, %19 : vector<8x128xi32>
    %c8_i32_3 = arith.constant 8 : i32
    %21 = tpu.dynamic_rotate %0 by %c8_i32_3 dim 1 : vector<8x128xi32>, i32 -> vector<8x128xi32>
    %22 = arith.cmpi eq, %21, %20 : vector<8x128xi32>
    %c120_i32 = arith.constant 120 : i32
    %23 = tpu.dynamic_rotate %0 by %c120_i32 dim 1 : vector<8x128xi32>, i32 -> vector<8x128xi32>
    %24 = arith.cmpi eq, %23, %20 : vector<8x128xi32>
    %c16_i32 = arith.constant 16 : i32
    %25 = vector.broadcast %c16_i32 : i32 to vector<8x128xi32>
    %26 = arith.subi %0, %25 : vector<8x128xi32>
    %c16_i32_4 = arith.constant 16 : i32
    %27 = tpu.dynamic_rotate %0 by %c16_i32_4 dim 1 : vector<8x128xi32>, i32 -> vector<8x128xi32>
    %28 = arith.cmpi eq, %27, %26 : vector<8x128xi32>
    %c112_i32 = arith.constant 112 : i32
    %29 = tpu.dynamic_rotate %0 by %c112_i32 dim 1 : vector<8x128xi32>, i32 -> vector<8x128xi32>
    %30 = arith.cmpi eq, %29, %26 : vector<8x128xi32>
    %c32_i32 = arith.constant 32 : i32
    %31 = vector.broadcast %c32_i32 : i32 to vector<8x128xi32>
    %32 = arith.subi %0, %31 : vector<8x128xi32>
    %c32_i32_5 = arith.constant 32 : i32
    %33 = tpu.dynamic_rotate %0 by %c32_i32_5 dim 1 : vector<8x128xi32>, i32 -> vector<8x128xi32>
    %34 = arith.cmpi eq, %33, %32 : vector<8x128xi32>
    %c96_i32 = arith.constant 96 : i32
    %35 = tpu.dynamic_rotate %0 by %c96_i32 dim 1 : vector<8x128xi32>, i32 -> vector<8x128xi32>
    %36 = arith.cmpi eq, %35, %32 : vector<8x128xi32>
    %c64_i32 = arith.constant 64 : i32
    %37 = vector.broadcast %c64_i32 : i32 to vector<8x128xi32>
    %38 = arith.subi %0, %37 : vector<8x128xi32>
    %c64_i32_6 = arith.constant 64 : i32
    %39 = tpu.dynamic_rotate %0 by %c64_i32_6 dim 1 : vector<8x128xi32>, i32 -> vector<8x128xi32>
    %40 = arith.cmpi eq, %39, %38 : vector<8x128xi32>
    %c64_i32_7 = arith.constant 64 : i32
    %41 = tpu.dynamic_rotate %0 by %c64_i32_7 dim 1 : vector<8x128xi32>, i32 -> vector<8x128xi32>
    %42 = arith.cmpi eq, %41, %38 : vector<8x128xi32>
    %43 = tpu.iota {dimensions = array<i32: 1>} : vector<8x8xi32>
    %c16_i32_8 = arith.constant 16 : i32
    %44 = vector.broadcast %c16_i32_8 : i32 to vector<8x8xi32>
    %45 = arith.shli %43, %44 : vector<8x8xi32>
    %c0 = arith.constant 0 : index
    %c0_9 = arith.constant 0 : index
    %46 = vector.load %arg1[%c0, %c0_9] : memref<8x128xi32, #tpu.memory_space<vmem>>, vector<8x128xi32>
    %c0_i32 = arith.constant 0 : i32
    %47 = vector.broadcast %c0_i32 : i32 to vector<8x128xi32>
    %48 = arith.cmpi ne, %46, %47 : vector<8x128xi32>
    %49 = arith.extui %48 : vector<8x128xi1> to vector<8x128xi32>
    %50 = vector.shape_cast %49 : vector<8x128xi32> to vector<1x8x128xi32>
    %cst = arith.constant dense<0> : vector<1xi32>
    %51 = vector.multi_reduction <add>, %50, %cst [1, 2] : vector<1x8x128xi32> to vector<1xi32>
    %52 = vector.shape_cast %51 : vector<1xi32> to vector<1x1x1xi32>
    %53 = vector.extract %52[0, 0, 0] : i32 from vector<1x1x1xi32>
    %c0_i32_10 = arith.constant 0 : i32
    %54 = arith.addi %c0_i32_10, %53 : i32
    %c1_i32_11 = arith.constant 1 : i32
    %55 = tpu.dynamic_rotate %49 by %c1_i32_11 dim 1 : vector<8x128xi32>, i32 -> vector<8x128xi32>
    %c127_i32_12 = arith.constant 127 : i32
    %56 = tpu.dynamic_rotate %49 by %c127_i32_12 dim 1 : vector<8x128xi32>, i32 -> vector<8x128xi32>
    %c0_i32_13 = arith.constant 0 : i32
    %57 = vector.broadcast %c0_i32_13 : i32 to vector<8x128xi32>
    %58 = arith.select %6, %56, %57 : vector<8x128xi1>, vector<8x128xi32>
    %59 = arith.select %4, %55, %58 : vector<8x128xi1>, vector<8x128xi32>
    %60 = arith.addi %49, %59 : vector<8x128xi32>
    %c2_i32_14 = arith.constant 2 : i32
    %61 = tpu.dynamic_rotate %60 by %c2_i32_14 dim 1 : vector<8x128xi32>, i32 -> vector<8x128xi32>
    %c126_i32_15 = arith.constant 126 : i32
    %62 = tpu.dynamic_rotate %60 by %c126_i32_15 dim 1 : vector<8x128xi32>, i32 -> vector<8x128xi32>
    %c0_i32_16 = arith.constant 0 : i32
    %63 = vector.broadcast %c0_i32_16 : i32 to vector<8x128xi32>
    %64 = arith.select %12, %62, %63 : vector<8x128xi1>, vector<8x128xi32>
    %65 = arith.select %10, %61, %64 : vector<8x128xi1>, vector<8x128xi32>
    %66 = arith.addi %60, %65 : vector<8x128xi32>
    %c4_i32_17 = arith.constant 4 : i32
    %67 = tpu.dynamic_rotate %66 by %c4_i32_17 dim 1 : vector<8x128xi32>, i32 -> vector<8x128xi32>
    %c124_i32_18 = arith.constant 124 : i32
    %68 = tpu.dynamic_rotate %66 by %c124_i32_18 dim 1 : vector<8x128xi32>, i32 -> vector<8x128xi32>
    %c0_i32_19 = arith.constant 0 : i32
    %69 = vector.broadcast %c0_i32_19 : i32 to vector<8x128xi32>
    %70 = arith.select %18, %68, %69 : vector<8x128xi1>, vector<8x128xi32>
    %71 = arith.select %16, %67, %70 : vector<8x128xi1>, vector<8x128xi32>
    %72 = arith.addi %66, %71 : vector<8x128xi32>
    %c8_i32_20 = arith.constant 8 : i32
    %73 = tpu.dynamic_rotate %72 by %c8_i32_20 dim 1 : vector<8x128xi32>, i32 -> vector<8x128xi32>
    %c120_i32_21 = arith.constant 120 : i32
    %74 = tpu.dynamic_rotate %72 by %c120_i32_21 dim 1 : vector<8x128xi32>, i32 -> vector<8x128xi32>
    %c0_i32_22 = arith.constant 0 : i32
    %75 = vector.broadcast %c0_i32_22 : i32 to vector<8x128xi32>
    %76 = arith.select %24, %74, %75 : vector<8x128xi1>, vector<8x128xi32>
    %77 = arith.select %22, %73, %76 : vector<8x128xi1>, vector<8x128xi32>
    %78 = arith.addi %72, %77 : vector<8x128xi32>
    %c16_i32_23 = arith.constant 16 : i32
    %79 = tpu.dynamic_rotate %78 by %c16_i32_23 dim 1 : vector<8x128xi32>, i32 -> vector<8x128xi32>
    %c112_i32_24 = arith.constant 112 : i32
    %80 = tpu.dynamic_rotate %78 by %c112_i32_24 dim 1 : vector<8x128xi32>, i32 -> vector<8x128xi32>
    %c0_i32_25 = arith.constant 0 : i32
    %81 = vector.broadcast %c0_i32_25 : i32 to vector<8x128xi32>
    %82 = arith.select %30, %80, %81 : vector<8x128xi1>, vector<8x128xi32>
    %83 = arith.select %28, %79, %82 : vector<8x128xi1>, vector<8x128xi32>
    %84 = arith.addi %78, %83 : vector<8x128xi32>
    %c32_i32_26 = arith.constant 32 : i32
    %85 = tpu.dynamic_rotate %84 by %c32_i32_26 dim 1 : vector<8x128xi32>, i32 -> vector<8x128xi32>
    %c96_i32_27 = arith.constant 96 : i32
    %86 = tpu.dynamic_rotate %84 by %c96_i32_27 dim 1 : vector<8x128xi32>, i32 -> vector<8x128xi32>
    %c0_i32_28 = arith.constant 0 : i32
    %87 = vector.broadcast %c0_i32_28 : i32 to vector<8x128xi32>
    %88 = arith.select %36, %86, %87 : vector<8x128xi1>, vector<8x128xi32>
    %89 = arith.select %34, %85, %88 : vector<8x128xi1>, vector<8x128xi32>
    %90 = arith.addi %84, %89 : vector<8x128xi32>
    %c64_i32_29 = arith.constant 64 : i32
    %91 = tpu.dynamic_rotate %90 by %c64_i32_29 dim 1 : vector<8x128xi32>, i32 -> vector<8x128xi32>
    %c64_i32_30 = arith.constant 64 : i32
    %92 = tpu.dynamic_rotate %90 by %c64_i32_30 dim 1 : vector<8x128xi32>, i32 -> vector<8x128xi32>
    %c0_i32_31 = arith.constant 0 : i32
    %93 = vector.broadcast %c0_i32_31 : i32 to vector<8x128xi32>
    %94 = arith.select %42, %92, %93 : vector<8x128xi1>, vector<8x128xi32>
    %95 = arith.select %40, %91, %94 : vector<8x128xi1>, vector<8x128xi32>
    %96 = arith.addi %90, %95 : vector<8x128xi32>
    %c1_i32_32 = arith.constant 1 : i32
    %97 = vector.broadcast %c1_i32_32 : i32 to vector<8x128xi32>
    %98 = arith.subi %96, %97 : vector<8x128xi32>
    %c16_i32_33 = arith.constant 16 : i32
    %99 = vector.broadcast %c16_i32_33 : i32 to vector<8x128xi32>
    %100 = arith.shli %98, %99 : vector<8x128xi32>
    %101 = arith.ori %100, %46 : vector<8x128xi32>
    %c-1_i32 = arith.constant -1 : i32
    %102 = vector.broadcast %c-1_i32 : i32 to vector<8x128xi32>
    %103 = arith.select %48, %101, %102 : vector<8x128xi1>, vector<8x128xi32>
    %104 = vector.shape_cast %103 : vector<8x128xi32> to vector<8x1x128xi32>
    %c0_34 = arith.constant 0 : index
    %c0_35 = arith.constant 0 : index
    %105 = vector.load %arg2[%c0_34, %c0_35] : memref<8x128xi32, #tpu.memory_space<vmem>>, vector<8x8xi32>
    %c0_i32_36 = arith.constant 0 : i32
    %106 = vector.broadcast %c0_i32_36 : i32 to vector<8x8xi32>
    %107 = arith.addi %45, %106 : vector<8x8xi32>
    %108 = arith.ori %107, %105 : vector<8x8xi32>
    %109 = vector.shape_cast %108 : vector<8x8xi32> to vector<8x8x1xi32>
    %110 = vector.broadcast %104 : vector<8x1x128xi32> to vector<8x8x128xi32>
    %111 = vector.broadcast %109 : vector<8x8x1xi32> to vector<8x8x128xi32>
    %112 = arith.cmpi eq, %110, %111 : vector<8x8x128xi32>
    %113 = arith.extui %112 : vector<8x8x128xi1> to vector<8x8x128xi32>
    %114 = vector.shape_cast %113 : vector<8x8x128xi32> to vector<1x8x8x128xi32>
    %cst_37 = arith.constant dense<0> : vector<1xi32>
    %115 = vector.multi_reduction <add>, %114, %cst_37 [1, 2, 3] : vector<1x8x8x128xi32> to vector<1xi32>
    %116 = vector.shape_cast %115 : vector<1xi32> to vector<1x1x1x1xi32>
    %117 = vector.extract %116[0, 0, 0, 0] : i32 from vector<1x1x1x1xi32>
    %c0_i32_38 = arith.constant 0 : i32
    %118 = arith.addi %c0_i32_38, %117 : i32
    %c0_39 = arith.constant 0 : index
    %c8 = arith.constant 8 : index
    %119 = vector.load %arg2[%c0_39, %c8] : memref<8x128xi32, #tpu.memory_space<vmem>>, vector<8x8xi32>
    %c524288_i32 = arith.constant 524288 : i32
    %120 = vector.broadcast %c524288_i32 : i32 to vector<8x8xi32>
    %121 = arith.addi %45, %120 : vector<8x8xi32>
    %122 = arith.ori %121, %119 : vector<8x8xi32>
    %123 = vector.shape_cast %122 : vector<8x8xi32> to vector<8x8x1xi32>
    %124 = vector.broadcast %104 : vector<8x1x128xi32> to vector<8x8x128xi32>
    %125 = vector.broadcast %123 : vector<8x8x1xi32> to vector<8x8x128xi32>
    %126 = arith.cmpi eq, %124, %125 : vector<8x8x128xi32>
    %127 = arith.extui %126 : vector<8x8x128xi1> to vector<8x8x128xi32>
    %128 = vector.shape_cast %127 : vector<8x8x128xi32> to vector<1x8x8x128xi32>
    %cst_40 = arith.constant dense<0> : vector<1xi32>
    %129 = vector.multi_reduction <add>, %128, %cst_40 [1, 2, 3] : vector<1x8x8x128xi32> to vector<1xi32>
    %130 = vector.shape_cast %129 : vector<1xi32> to vector<1x1x1x1xi32>
    %131 = vector.extract %130[0, 0, 0, 0] : i32 from vector<1x1x1x1xi32>
    %132 = arith.addi %118, %131 : i32
    %c0_41 = arith.constant 0 : index
    %c16 = arith.constant 16 : index
    %133 = vector.load %arg2[%c0_41, %c16] : memref<8x128xi32, #tpu.memory_space<vmem>>, vector<8x8xi32>
    %c1048576_i32 = arith.constant 1048576 : i32
    %134 = vector.broadcast %c1048576_i32 : i32 to vector<8x8xi32>
    %135 = arith.addi %45, %134 : vector<8x8xi32>
    %136 = arith.ori %135, %133 : vector<8x8xi32>
    %137 = vector.shape_cast %136 : vector<8x8xi32> to vector<8x8x1xi32>
    %138 = vector.broadcast %104 : vector<8x1x128xi32> to vector<8x8x128xi32>
    %139 = vector.broadcast %137 : vector<8x8x1xi32> to vector<8x8x128xi32>
    %140 = arith.cmpi eq, %138, %139 : vector<8x8x128xi32>
    %141 = arith.extui %140 : vector<8x8x128xi1> to vector<8x8x128xi32>
    %142 = vector.shape_cast %141 : vector<8x8x128xi32> to vector<1x8x8x128xi32>
    %cst_42 = arith.constant dense<0> : vector<1xi32>
    %143 = vector.multi_reduction <add>, %142, %cst_42 [1, 2, 3] : vector<1x8x8x128xi32> to vector<1xi32>
    %144 = vector.shape_cast %143 : vector<1xi32> to vector<1x1x1x1xi32>
    %145 = vector.extract %144[0, 0, 0, 0] : i32 from vector<1x1x1x1xi32>
    %146 = arith.addi %132, %145 : i32
    %c0_43 = arith.constant 0 : index
    %c24 = arith.constant 24 : index
    %147 = vector.load %arg2[%c0_43, %c24] : memref<8x128xi32, #tpu.memory_space<vmem>>, vector<8x8xi32>
    %c1572864_i32 = arith.constant 1572864 : i32
    %148 = vector.broadcast %c1572864_i32 : i32 to vector<8x8xi32>
    %149 = arith.addi %45, %148 : vector<8x8xi32>
    %150 = arith.ori %149, %147 : vector<8x8xi32>
    %151 = vector.shape_cast %150 : vector<8x8xi32> to vector<8x8x1xi32>
    %152 = vector.broadcast %104 : vector<8x1x128xi32> to vector<8x8x128xi32>
    %153 = vector.broadcast %151 : vector<8x8x1xi32> to vector<8x8x128xi32>
    %154 = arith.cmpi eq, %152, %153 : vector<8x8x128xi32>
    %155 = arith.extui %154 : vector<8x8x128xi1> to vector<8x8x128xi32>
    %156 = vector.shape_cast %155 : vector<8x8x128xi32> to vector<1x8x8x128xi32>
    %cst_44 = arith.constant dense<0> : vector<1xi32>
    %157 = vector.multi_reduction <add>, %156, %cst_44 [1, 2, 3] : vector<1x8x8x128xi32> to vector<1xi32>
    %158 = vector.shape_cast %157 : vector<1xi32> to vector<1x1x1x1xi32>
    %159 = vector.extract %158[0, 0, 0, 0] : i32 from vector<1x1x1x1xi32>
    %160 = arith.addi %146, %159 : i32
    %c0_45 = arith.constant 0 : index
    %c32 = arith.constant 32 : index
    %161 = vector.load %arg2[%c0_45, %c32] : memref<8x128xi32, #tpu.memory_space<vmem>>, vector<8x8xi32>
    %c2097152_i32 = arith.constant 2097152 : i32
    %162 = vector.broadcast %c2097152_i32 : i32 to vector<8x8xi32>
    %163 = arith.addi %45, %162 : vector<8x8xi32>
    %164 = arith.ori %163, %161 : vector<8x8xi32>
    %165 = vector.shape_cast %164 : vector<8x8xi32> to vector<8x8x1xi32>
    %166 = vector.broadcast %104 : vector<8x1x128xi32> to vector<8x8x128xi32>
    %167 = vector.broadcast %165 : vector<8x8x1xi32> to vector<8x8x128xi32>
    %168 = arith.cmpi eq, %166, %167 : vector<8x8x128xi32>
    %169 = arith.extui %168 : vector<8x8x128xi1> to vector<8x8x128xi32>
    %170 = vector.shape_cast %169 : vector<8x8x128xi32> to vector<1x8x8x128xi32>
    %cst_46 = arith.constant dense<0> : vector<1xi32>
    %171 = vector.multi_reduction <add>, %170, %cst_46 [1, 2, 3] : vector<1x8x8x128xi32> to vector<1xi32>
    %172 = vector.shape_cast %171 : vector<1xi32> to vector<1x1x1x1xi32>
    %173 = vector.extract %172[0, 0, 0, 0] : i32 from vector<1x1x1x1xi32>
    %174 = arith.addi %160, %173 : i32
    %c0_47 = arith.constant 0 : index
    %c40 = arith.constant 40 : index
    %175 = vector.load %arg2[%c0_47, %c40] : memref<8x128xi32, #tpu.memory_space<vmem>>, vector<8x8xi32>
    %c2621440_i32 = arith.constant 2621440 : i32
    %176 = vector.broadcast %c2621440_i32 : i32 to vector<8x8xi32>
    %177 = arith.addi %45, %176 : vector<8x8xi32>
    %178 = arith.ori %177, %175 : vector<8x8xi32>
    %179 = vector.shape_cast %178 : vector<8x8xi32> to vector<8x8x1xi32>
    %180 = vector.broadcast %104 : vector<8x1x128xi32> to vector<8x8x128xi32>
    %181 = vector.broadcast %179 : vector<8x8x1xi32> to vector<8x8x128xi32>
    %182 = arith.cmpi eq, %180, %181 : vector<8x8x128xi32>
    %183 = arith.extui %182 : vector<8x8x128xi1> to vector<8x8x128xi32>
    %184 = vector.shape_cast %183 : vector<8x8x128xi32> to vector<1x8x8x128xi32>
    %cst_48 = arith.constant dense<0> : vector<1xi32>
    %185 = vector.multi_reduction <add>, %184, %cst_48 [1, 2, 3] : vector<1x8x8x128xi32> to vector<1xi32>
    %186 = vector.shape_cast %185 : vector<1xi32> to vector<1x1x1x1xi32>
    %187 = vector.extract %186[0, 0, 0, 0] : i32 from vector<1x1x1x1xi32>
    %188 = arith.addi %174, %187 : i32
    %c0_49 = arith.constant 0 : index
    %c48 = arith.constant 48 : index
    %189 = vector.load %arg2[%c0_49, %c48] : memref<8x128xi32, #tpu.memory_space<vmem>>, vector<8x8xi32>
    %c3145728_i32 = arith.constant 3145728 : i32
    %190 = vector.broadcast %c3145728_i32 : i32 to vector<8x8xi32>
    %191 = arith.addi %45, %190 : vector<8x8xi32>
    %192 = arith.ori %191, %189 : vector<8x8xi32>
    %193 = vector.shape_cast %192 : vector<8x8xi32> to vector<8x8x1xi32>
    %194 = vector.broadcast %104 : vector<8x1x128xi32> to vector<8x8x128xi32>
    %195 = vector.broadcast %193 : vector<8x8x1xi32> to vector<8x8x128xi32>
    %196 = arith.cmpi eq, %194, %195 : vector<8x8x128xi32>
    %197 = arith.extui %196 : vector<8x8x128xi1> to vector<8x8x128xi32>
    %198 = vector.shape_cast %197 : vector<8x8x128xi32> to vector<1x8x8x128xi32>
    %cst_50 = arith.constant dense<0> : vector<1xi32>
    %199 = vector.multi_reduction <add>, %198, %cst_50 [1, 2, 3] : vector<1x8x8x128xi32> to vector<1xi32>
    %200 = vector.shape_cast %199 : vector<1xi32> to vector<1x1x1x1xi32>
    %201 = vector.extract %200[0, 0, 0, 0] : i32 from vector<1x1x1x1xi32>
    %202 = arith.addi %188, %201 : i32
    %c0_51 = arith.constant 0 : index
    %c56 = arith.constant 56 : index
    %203 = vector.load %arg2[%c0_51, %c56] : memref<8x128xi32, #tpu.memory_space<vmem>>, vector<8x8xi32>
    %c3670016_i32 = arith.constant 3670016 : i32
    %204 = vector.broadcast %c3670016_i32 : i32 to vector<8x8xi32>
    %205 = arith.addi %45, %204 : vector<8x8xi32>
    %206 = arith.ori %205, %203 : vector<8x8xi32>
    %207 = vector.shape_cast %206 : vector<8x8xi32> to vector<8x8x1xi32>
    %208 = vector.broadcast %104 : vector<8x1x128xi32> to vector<8x8x128xi32>
    %209 = vector.broadcast %207 : vector<8x8x1xi32> to vector<8x8x128xi32>
    %210 = arith.cmpi eq, %208, %209 : vector<8x8x128xi32>
    %211 = arith.extui %210 : vector<8x8x128xi1> to vector<8x8x128xi32>
    %212 = vector.shape_cast %211 : vector<8x8x128xi32> to vector<1x8x8x128xi32>
    %cst_52 = arith.constant dense<0> : vector<1xi32>
    %213 = vector.multi_reduction <add>, %212, %cst_52 [1, 2, 3] : vector<1x8x8x128xi32> to vector<1xi32>
    %214 = vector.shape_cast %213 : vector<1xi32> to vector<1x1x1x1xi32>
    %215 = vector.extract %214[0, 0, 0, 0] : i32 from vector<1x1x1x1xi32>
    %216 = arith.addi %202, %215 : i32
    %c0_53 = arith.constant 0 : index
    %c64 = arith.constant 64 : index
    %217 = vector.load %arg2[%c0_53, %c64] : memref<8x128xi32, #tpu.memory_space<vmem>>, vector<8x8xi32>
    %c4194304_i32 = arith.constant 4194304 : i32
    %218 = vector.broadcast %c4194304_i32 : i32 to vector<8x8xi32>
    %219 = arith.addi %45, %218 : vector<8x8xi32>
    %220 = arith.ori %219, %217 : vector<8x8xi32>
    %221 = vector.shape_cast %220 : vector<8x8xi32> to vector<8x8x1xi32>
    %222 = vector.broadcast %104 : vector<8x1x128xi32> to vector<8x8x128xi32>
    %223 = vector.broadcast %221 : vector<8x8x1xi32> to vector<8x8x128xi32>
    %224 = arith.cmpi eq, %222, %223 : vector<8x8x128xi32>
    %225 = arith.extui %224 : vector<8x8x128xi1> to vector<8x8x128xi32>
    %226 = vector.shape_cast %225 : vector<8x8x128xi32> to vector<1x8x8x128xi32>
    %cst_54 = arith.constant dense<0> : vector<1xi32>
    %227 = vector.multi_reduction <add>, %226, %cst_54 [1, 2, 3] : vector<1x8x8x128xi32> to vector<1xi32>
    %228 = vector.shape_cast %227 : vector<1xi32> to vector<1x1x1x1xi32>
    %229 = vector.extract %228[0, 0, 0, 0] : i32 from vector<1x1x1x1xi32>
    %230 = arith.addi %216, %229 : i32
    %c0_55 = arith.constant 0 : index
    %c72 = arith.constant 72 : index
    %231 = vector.load %arg2[%c0_55, %c72] : memref<8x128xi32, #tpu.memory_space<vmem>>, vector<8x8xi32>
    %c4718592_i32 = arith.constant 4718592 : i32
    %232 = vector.broadcast %c4718592_i32 : i32 to vector<8x8xi32>
    %233 = arith.addi %45, %232 : vector<8x8xi32>
    %234 = arith.ori %233, %231 : vector<8x8xi32>
    %235 = vector.shape_cast %234 : vector<8x8xi32> to vector<8x8x1xi32>
    %236 = vector.broadcast %104 : vector<8x1x128xi32> to vector<8x8x128xi32>
    %237 = vector.broadcast %235 : vector<8x8x1xi32> to vector<8x8x128xi32>
    %238 = arith.cmpi eq, %236, %237 : vector<8x8x128xi32>
    %239 = arith.extui %238 : vector<8x8x128xi1> to vector<8x8x128xi32>
    %240 = vector.shape_cast %239 : vector<8x8x128xi32> to vector<1x8x8x128xi32>
    %cst_56 = arith.constant dense<0> : vector<1xi32>
    %241 = vector.multi_reduction <add>, %240, %cst_56 [1, 2, 3] : vector<1x8x8x128xi32> to vector<1xi32>
    %242 = vector.shape_cast %241 : vector<1xi32> to vector<1x1x1x1xi32>
    %243 = vector.extract %242[0, 0, 0, 0] : i32 from vector<1x1x1x1xi32>
    %244 = arith.addi %230, %243 : i32
    %c0_57 = arith.constant 0 : index
    %c80 = arith.constant 80 : index
    %245 = vector.load %arg2[%c0_57, %c80] : memref<8x128xi32, #tpu.memory_space<vmem>>, vector<8x8xi32>
    %c5242880_i32 = arith.constant 5242880 : i32
    %246 = vector.broadcast %c5242880_i32 : i32 to vector<8x8xi32>
    %247 = arith.addi %45, %246 : vector<8x8xi32>
    %248 = arith.ori %247, %245 : vector<8x8xi32>
    %249 = vector.shape_cast %248 : vector<8x8xi32> to vector<8x8x1xi32>
    %250 = vector.broadcast %104 : vector<8x1x128xi32> to vector<8x8x128xi32>
    %251 = vector.broadcast %249 : vector<8x8x1xi32> to vector<8x8x128xi32>
    %252 = arith.cmpi eq, %250, %251 : vector<8x8x128xi32>
    %253 = arith.extui %252 : vector<8x8x128xi1> to vector<8x8x128xi32>
    %254 = vector.shape_cast %253 : vector<8x8x128xi32> to vector<1x8x8x128xi32>
    %cst_58 = arith.constant dense<0> : vector<1xi32>
    %255 = vector.multi_reduction <add>, %254, %cst_58 [1, 2, 3] : vector<1x8x8x128xi32> to vector<1xi32>
    %256 = vector.shape_cast %255 : vector<1xi32> to vector<1x1x1x1xi32>
    %257 = vector.extract %256[0, 0, 0, 0] : i32 from vector<1x1x1x1xi32>
    %258 = arith.addi %244, %257 : i32
    %c0_59 = arith.constant 0 : index
    %c88 = arith.constant 88 : index
    %259 = vector.load %arg2[%c0_59, %c88] : memref<8x128xi32, #tpu.memory_space<vmem>>, vector<8x8xi32>
    %c5767168_i32 = arith.constant 5767168 : i32
    %260 = vector.broadcast %c5767168_i32 : i32 to vector<8x8xi32>
    %261 = arith.addi %45, %260 : vector<8x8xi32>
    %262 = arith.ori %261, %259 : vector<8x8xi32>
    %263 = vector.shape_cast %262 : vector<8x8xi32> to vector<8x8x1xi32>
    %264 = vector.broadcast %104 : vector<8x1x128xi32> to vector<8x8x128xi32>
    %265 = vector.broadcast %263 : vector<8x8x1xi32> to vector<8x8x128xi32>
    %266 = arith.cmpi eq, %264, %265 : vector<8x8x128xi32>
    %267 = arith.extui %266 : vector<8x8x128xi1> to vector<8x8x128xi32>
    %268 = vector.shape_cast %267 : vector<8x8x128xi32> to vector<1x8x8x128xi32>
    %cst_60 = arith.constant dense<0> : vector<1xi32>
    %269 = vector.multi_reduction <add>, %268, %cst_60 [1, 2, 3] : vector<1x8x8x128xi32> to vector<1xi32>
    %270 = vector.shape_cast %269 : vector<1xi32> to vector<1x1x1x1xi32>
    %271 = vector.extract %270[0, 0, 0, 0] : i32 from vector<1x1x1x1xi32>
    %272 = arith.addi %258, %271 : i32
    %c0_61 = arith.constant 0 : index
    %c96 = arith.constant 96 : index
    %273 = vector.load %arg2[%c0_61, %c96] : memref<8x128xi32, #tpu.memory_space<vmem>>, vector<8x8xi32>
    %c6291456_i32 = arith.constant 6291456 : i32
    %274 = vector.broadcast %c6291456_i32 : i32 to vector<8x8xi32>
    %275 = arith.addi %45, %274 : vector<8x8xi32>
    %276 = arith.ori %275, %273 : vector<8x8xi32>
    %277 = vector.shape_cast %276 : vector<8x8xi32> to vector<8x8x1xi32>
    %278 = vector.broadcast %104 : vector<8x1x128xi32> to vector<8x8x128xi32>
    %279 = vector.broadcast %277 : vector<8x8x1xi32> to vector<8x8x128xi32>
    %280 = arith.cmpi eq, %278, %279 : vector<8x8x128xi32>
    %281 = arith.extui %280 : vector<8x8x128xi1> to vector<8x8x128xi32>
    %282 = vector.shape_cast %281 : vector<8x8x128xi32> to vector<1x8x8x128xi32>
    %cst_62 = arith.constant dense<0> : vector<1xi32>
    %283 = vector.multi_reduction <add>, %282, %cst_62 [1, 2, 3] : vector<1x8x8x128xi32> to vector<1xi32>
    %284 = vector.shape_cast %283 : vector<1xi32> to vector<1x1x1x1xi32>
    %285 = vector.extract %284[0, 0, 0, 0] : i32 from vector<1x1x1x1xi32>
    %286 = arith.addi %272, %285 : i32
    %c0_63 = arith.constant 0 : index
    %c104 = arith.constant 104 : index
    %287 = vector.load %arg2[%c0_63, %c104] : memref<8x128xi32, #tpu.memory_space<vmem>>, vector<8x8xi32>
    %c6815744_i32 = arith.constant 6815744 : i32
    %288 = vector.broadcast %c6815744_i32 : i32 to vector<8x8xi32>
    %289 = arith.addi %45, %288 : vector<8x8xi32>
    %290 = arith.ori %289, %287 : vector<8x8xi32>
    %291 = vector.shape_cast %290 : vector<8x8xi32> to vector<8x8x1xi32>
    %292 = vector.broadcast %104 : vector<8x1x128xi32> to vector<8x8x128xi32>
    %293 = vector.broadcast %291 : vector<8x8x1xi32> to vector<8x8x128xi32>
    %294 = arith.cmpi eq, %292, %293 : vector<8x8x128xi32>
    %295 = arith.extui %294 : vector<8x8x128xi1> to vector<8x8x128xi32>
    %296 = vector.shape_cast %295 : vector<8x8x128xi32> to vector<1x8x8x128xi32>
    %cst_64 = arith.constant dense<0> : vector<1xi32>
    %297 = vector.multi_reduction <add>, %296, %cst_64 [1, 2, 3] : vector<1x8x8x128xi32> to vector<1xi32>
    %298 = vector.shape_cast %297 : vector<1xi32> to vector<1x1x1x1xi32>
    %299 = vector.extract %298[0, 0, 0, 0] : i32 from vector<1x1x1x1xi32>
    %300 = arith.addi %286, %299 : i32
    %c0_65 = arith.constant 0 : index
    %c112 = arith.constant 112 : index
    %301 = vector.load %arg2[%c0_65, %c112] : memref<8x128xi32, #tpu.memory_space<vmem>>, vector<8x8xi32>
    %c7340032_i32 = arith.constant 7340032 : i32
    %302 = vector.broadcast %c7340032_i32 : i32 to vector<8x8xi32>
    %303 = arith.addi %45, %302 : vector<8x8xi32>
    %304 = arith.ori %303, %301 : vector<8x8xi32>
    %305 = vector.shape_cast %304 : vector<8x8xi32> to vector<8x8x1xi32>
    %306 = vector.broadcast %104 : vector<8x1x128xi32> to vector<8x8x128xi32>
    %307 = vector.broadcast %305 : vector<8x8x1xi32> to vector<8x8x128xi32>
    %308 = arith.cmpi eq, %306, %307 : vector<8x8x128xi32>
    %309 = arith.extui %308 : vector<8x8x128xi1> to vector<8x8x128xi32>
    %310 = vector.shape_cast %309 : vector<8x8x128xi32> to vector<1x8x8x128xi32>
    %cst_66 = arith.constant dense<0> : vector<1xi32>
    %311 = vector.multi_reduction <add>, %310, %cst_66 [1, 2, 3] : vector<1x8x8x128xi32> to vector<1xi32>
    %312 = vector.shape_cast %311 : vector<1xi32> to vector<1x1x1x1xi32>
    %313 = vector.extract %312[0, 0, 0, 0] : i32 from vector<1x1x1x1xi32>
    %314 = arith.addi %300, %313 : i32
    %c0_67 = arith.constant 0 : index
    %c120 = arith.constant 120 : index
    %315 = vector.load %arg2[%c0_67, %c120] : memref<8x128xi32, #tpu.memory_space<vmem>>, vector<8x8xi32>
    %c7864320_i32 = arith.constant 7864320 : i32
    %316 = vector.broadcast %c7864320_i32 : i32 to vector<8x8xi32>
    %317 = arith.addi %45, %316 : vector<8x8xi32>
    %318 = arith.ori %317, %315 : vector<8x8xi32>
    %319 = vector.shape_cast %318 : vector<8x8xi32> to vector<8x8x1xi32>
    %320 = vector.broadcast %104 : vector<8x1x128xi32> to vector<8x8x128xi32>
    %321 = vector.broadcast %319 : vector<8x8x1xi32> to vector<8x8x128xi32>
    %322 = arith.cmpi eq, %320, %321 : vector<8x8x128xi32>
    %323 = arith.extui %322 : vector<8x8x128xi1> to vector<8x8x128xi32>
    %324 = vector.shape_cast %323 : vector<8x8x128xi32> to vector<1x8x8x128xi32>
    %cst_68 = arith.constant dense<0> : vector<1xi32>
    %325 = vector.multi_reduction <add>, %324, %cst_68 [1, 2, 3] : vector<1x8x8x128xi32> to vector<1xi32>
    %326 = vector.shape_cast %325 : vector<1xi32> to vector<1x1x1x1xi32>
    %327 = vector.extract %326[0, 0, 0, 0] : i32 from vector<1x1x1x1xi32>
    %328 = arith.addi %314, %327 : i32
    %c0_i32_69 = arith.constant 0 : i32
    %329 = vector.broadcast %c0_i32_69 : i32 to vector<1x8x128xi32>
    %330 = vector.broadcast %328 : i32 to vector<1x8x128xi32>
    %331 = arith.addi %329, %330 : vector<1x8x128xi32>
    %c0_70 = arith.constant 0 : index
    %c0_71 = arith.constant 0 : index
    %c0_72 = arith.constant 0 : index
    %332 = vector.load %arg3[%c0_70, %c0_71, %c0_72] : memref<1x8x128xi32, #tpu.memory_space<vmem>>, vector<1x8x128xi32>
    tpu.vector_store %arg3[%c0_70, %c0_71, %c0_72], %331 {strides = array<i32>} : memref<1x8x128xi32, #tpu.memory_space<vmem>>, vector<1x8x128xi32>,
    %c0_i32_73 = arith.constant 0 : i32
    %333 = vector.broadcast %c0_i32_73 : i32 to vector<1x8x128xi32>
    %334 = vector.broadcast %54 : i32 to vector<1x8x128xi32>
    %335 = arith.addi %333, %334 : vector<1x8x128xi32>
    %c0_74 = arith.constant 0 : index
    %c0_75 = arith.constant 0 : index
    %c0_76 = arith.constant 0 : index
    %336 = vector.load %arg4[%c0_74, %c0_75, %c0_76] : memref<1x8x128xi32, #tpu.memory_space<vmem>>, vector<1x8x128xi32>
    tpu.vector_store %arg4[%c0_74, %c0_75, %c0_76], %335 {strides = array<i32>} : memref<1x8x128xi32, #tpu.memory_space<vmem>>, vector<1x8x128xi32>,
    return
  }
  func.func @transform_0(%arg0: i32) -> (i32, i32) {
    %c0_i32 = arith.constant 0 : i32
    %c0_i32_0 = arith.constant 0 : i32
    return %arg0, %c0_i32 : i32, i32
  }
  func.func @transform_1(%arg0: i32) -> (i32, i32) {
    %c0_i32 = arith.constant 0 : i32
    %c0_i32_0 = arith.constant 0 : i32
    return %arg0, %c0_i32 : i32, i32
  }
  func.func @transform_2(%arg0: i32) -> (i32, i32, i32) {
    %c0_i32 = arith.constant 0 : i32
    %c0_i32_0 = arith.constant 0 : i32
    %c0_i32_1 = arith.constant 0 : i32
    return %arg0, %c0_i32, %c0_i32_0 : i32, i32, i32
  }
  func.func @transform_3(%arg0: i32) -> (i32, i32, i32) {
    %c0_i32 = arith.constant 0 : i32
    %c0_i32_0 = arith.constant 0 : i32
    %c0_i32_1 = arith.constant 0 : i32
    return %arg0, %c0_i32, %c0_i32_0 : i32, i32, i32
  }
}

</mosaic_0001>

<bundles_post_ra>
// kernel: tpu_custom_call.1
= control target key start
LH: loop header
LB: loop body
LE: loop exit
PB: predicated region body
PF: predicated region fallthrough
CT: control target
= control target key end

     0   :  { %9 = vsyncpa [#allocation3], 0  ;;  %s3209_s0 = inlined_call_operand.hbm [shape: s32[8,128], index: 0, kind: input, shape index: {}]   ;;  %s3210_s1 = inlined_call_operand.hbm [shape: s32[8,128], index: 1, kind: input, shape index: {}]   ;;  %s3211_s2 = inlined_call_operand.hbm [shape: s32[1,8,128], index: 2, kind: output, shape index: {0}]   ;;  %s3212_s3 = inlined_call_operand.hbm [shape: s32[1,8,128], index: 3, kind: output, shape index: {1}]  }
   0x1   :  { %10 = vsyncpa [#allocation6], 0 }
   0x2   :  { %11 = vsyncpa [#allocation4], 0 }
   0x3   :  { %12 = vsyncpa [#allocation9], 0  ;;  %s2086_s12 = smov [#allocation2]   ;;  %s2087_s14 = smov [#allocation5]  }
   0x4   :  { %s19_s13 = sshll.u32 %s2086_s12, 4  ;;  %s29_s15 = sshll.u32 %s2087_s14, 4  ;;  %s20_s13 = int_to_ptr.vmem [resolvable:$true] %s19_s13  ;;  %s30_s15 = int_to_ptr.vmem [resolvable:$true] %s29_s15 }
   0x5   :  { %s1990_s18 = scalar_lea.hbm %s3209_s0, 128 }
   0x6   :  { %p1991_p0 = scmp.ne.s32.totalorder %s3209_s0, %s1990_s18  ;;  %p1994_p1 = scmp.lt.u32.totalorder %s1990_s18, %s3209_s0 }
   0x8   :  { %p1996_p2 = pnand %p1994_p1, %p1991_p0 }
   0xa   :  { %1999 = shalt.err (!%p1996_p2)
}
   0xb   :  { %s2000_s23 = scalar_lea.vmem %s20_s13, 128  ;;  %p2005_p4 = scmp.lt.s32.totalorder %s20_s13, %s20_s13 }
   0xc   :  { %p2001_p3 = scmp.ne.s32.totalorder %s20_s13, %s2000_s23  ;;  %p2006_p5 = scmp.lt.s32.totalorder %s2000_s23, %s2000_s23 }
   0xe   :  { %p2007_p6 = por %p2006_p5, %p2005_p4 }
  0x10   :  { %p2008_p7 = pnand %p2007_p6, %p2001_p3 }
  0x12   :  { %2011 = shalt.err (!%p2008_p7)
}
  0x13   :  { %22 = dma.hbm_to_vmem [thread:$0]  %s3209_s0, 128, %s20_s13, [#allocation3]  }
  0x14   :  { %s2012_s28 = scalar_lea.hbm %s3210_s1, 128 }
  0x15   :  { %p2013_p8 = scmp.ne.s32.totalorder %s3210_s1, %s2012_s28  ;;  %p2016_p9 = scmp.lt.u32.totalorder %s2012_s28, %s3210_s1 }
  0x17   :  { %p2018_p10 = pnand %p2016_p9, %p2013_p8 }
  0x19   :  { %2021 = shalt.err (!%p2018_p10)
}
  0x1a   :  { %s2022_s6 = scalar_lea.vmem %s30_s15, 128  ;;  %p2027_p12 = scmp.lt.s32.totalorder %s30_s15, %s30_s15 }
  0x1b   :  { %p2023_p11 = scmp.ne.s32.totalorder %s30_s15, %s2022_s6  ;;  %p2028_p13 = scmp.lt.s32.totalorder %s2022_s6, %s2022_s6 }
  0x1d   :  { %p2029_p0 = por %p2028_p13, %p2027_p12 }
  0x1f   :  { %p2030_p1 = pnand %p2029_p0, %p2023_p11 }
  0x21   :  { %2033 = shalt.err (!%p2030_p1)
}
  0x22   :  { %32 = dma.hbm_to_vmem [thread:$0]  %s3210_s1, 128, %s30_s15, [#allocation6]  }
  0x23   :  { %2078 = dma.done.wait [#allocation3], 128  }
  0x24   :  { %2079 = vsyncadd [#allocation3], 4294967168  ;;  %v39_v0 = vlaneseq }
  0x25   :  { %2080 = dma.done.wait [#allocation6], 128  }
  0x26   :  { %2081 = vsyncadd [#allocation6], 4294967168  ;;  %v2157_v1 = vand.u32 127, %v39_v0  ;;  %s2088_s8 = smov 2   ;;  %s2089_s9 = smov 1   ;;  %v2185_v2 = vld [vmem:[#allocation2] sm:$0xff] }
  0x27   :  { %s2090_s10 = smov 126   ;;  %s2091_s1 = smov 127   ;;  %vm89_vm0 = vcmp.ne.s32.totalorder %v2185_v2, 0  ;;  %v3213_v3 = vmov 0   ;;  %v2191_v9 = vshrl.u32 %v39_v0, 7  ;;  %v2196_v11 = vld [vmem:[#allocation5] sm:$0xff] }
  0x28   :  { %49 = vrot.lane.b32.xlu1 %v2157_v1, %s2088_s8  ;;  %42 = vrot.lane.b32.xlu0 %v2157_v1, %s2089_s9  ;;  %s2092_s11 = smov 124   ;;  %s2093_s12 = smov 4   ;;  %v90_v4 = vsel %vm89_vm0, 1, %v3213_v3  ;;  %v2194_v10 = vshll.u32 %v2157_v1, 16  ;;  %v1920_v37 = vadd.s32 4294967295, %v2157_v1 }
  0x29   :  { %s2094_s13 = smov 120   ;;  %s2095_s14 = smov 8   ;;  %v92_v5 = vshrl.u32 %v90_v4, 16  ;;  %v91_v6 = vand.u32 65535, %v90_v4  ;;  %v2199_v12 = vsub.s32 0, %v2191_v9  ;;  %v2210_v15 = vsub.s32 2, %v2191_v9 }
  0x2a   :  { %s2096_s15 = smov 112   ;;  %s2097_s16 = smov 16   ;;  %v2204_v13 = vor.u32 %v2196_v11, %v2194_v10  ;;  %v2215_v17 = vsub.s32 4, %v2191_v9  ;;  %v2220_v19 = vsub.s32 6, %v2191_v9  ;;  %v2250_v44 = vsub.s32 1, %v2191_v9 }
  0x2b   :  { %s2098_s17 = smov 96   ;;  %s2099_s18 = smov 32   ;;  %v94_v7 = vcvt.s32.f32 %v92_v5  ;;  %v93_v8 = vcvt.s32.f32 %v91_v6  ;;  %v2258_v51 = vsub.s32 3, %v2191_v9  ;;  %v2265_v56 = vsub.s32 5, %v2191_v9 }
  0x2c   :  { %52 = vrot.lane.b32.xlu1 %v2157_v1, %s2090_s10  ;;  %45 = vrot.lane.b32.xlu0 %v2157_v1, %s2091_s1  ;;  %s2100_s19 = smov 64   ;;  %v214_v14 = vrot.slane %v2204_v13, %v2199_v12  ;;  %v228_v16 = vrot.slane %v2204_v13, %v2210_v15  ;;  %v242_v18 = vrot.slane %v2204_v13, %v2215_v17  ;;  %v2272_v61 = vsub.s32 7, %v2191_v9  ;;  %s2102_s21 = smov 104  }
  0x2d   :  { %v256_v20 = vrot.slane %v2204_v13, %v2220_v19  ;;  %v221_v50 = vrot.slane %v2204_v13, %v2250_v44  ;;  %v235_v55 = vrot.slane %v2204_v13, %v2258_v51  ;;  %v249_v60 = vrot.slane %v2204_v13, %v2265_v56  ;;  %s2103_s22 = smov 88   ;;  %s2104_s23 = smov 80  }
  0x2e   :  { %3217 = vst [vmem:[#allocation14_spill] sm:$0xff] %v2272_v61  ;;  %v341_v63 = vadd.s32 524288, %v2194_v10  ;;  %v263_v0 = vrot.slane %v2204_v13, %v2272_v61  ;;  %s2105_s24 = smov 72   ;;  %s2106_s25 = smov 56  }
  0x2f   :  { %s2107_s26 = smov 48   ;;  %s2108_s27 = smov 40  }
  0x30   :  { %59 = vrot.lane.b32.xlu1 %v2157_v1, %s2092_s11  ;;  %56 = vrot.lane.b32.xlu0 %v2157_v1, %s2093_s12  ;;  %s2109_s28 = smov 24   ;;  %s2111_s29 = smov [#allocation8]  }
  0x31   :  { %s1906_s30 = sshll.u32 %s2111_s29, 4  ;;  %s1907_s30 = int_to_ptr.vmem [resolvable:$true] %s1906_s30 }
  0x32   :  { %s2034_s4 = scalar_lea.vmem %s1907_s30, 128  ;;  %p2039_p3 = scmp.lt.s32.totalorder %s1907_s30, %s1907_s30 }
  0x33   :  { %p2035_p2 = scmp.ne.s32.totalorder %s1907_s30, %s2034_s4  ;;  %p2040_p4 = scmp.lt.s32.totalorder %s2034_s4, %s2034_s4 }
  0x34   :  { %66 = vrot.lane.b32.xlu1 %v2157_v1, %s2094_s13  ;;  %63 = vrot.lane.b32.xlu0 %v2157_v1, %s2095_s14 }
  0x35   :  { %p2041_p5 = por %p2040_p4, %p2039_p3 }
  0x37   :  { %p2042_p6 = pnand %p2041_p5, %p2035_p2 }
  0x38   :  { %73 = vrot.lane.b32.xlu1 %v2157_v1, %s2096_s15  ;;  %70 = vrot.lane.b32.xlu0 %v2157_v1, %s2097_s16 }
  0x3c   :  { %80 = vrot.lane.b32.xlu1 %v2157_v1, %s2098_s17  ;;  %77 = vrot.lane.b32.xlu0 %v2157_v1, %s2099_s18 }
  0x40   :  { %84 = vrot.lane.b32.xlu0 %v2157_v1, %s2100_s19 }
  0x5f   :  { %97 = vadd.xlane.f32.xlu0 %v94_v7 }
  0x60   :  { %95 = vadd.xlane.f32.xlu1 %v93_v8 }
  0x71   :  { %112 = vrot.lane.b32.xlu1 %v90_v4, %s2091_s1 }
  0x75   :  { %110 = vrot.lane.b32.xlu0 %v90_v4, %s2089_s9 }
  0x79   :  { %216 = vbcast.lane.b32.xlu0 %v214_v14, 256 }
  0x7d   :  { %230 = vbcast.lane.b32.xlu0 %v228_v16, 256 }
  0x81   :  { %244 = vbcast.lane.b32.xlu0 %v242_v18, 256 }
  0x85   :  { %258 = vbcast.lane.b32.xlu0 %v256_v20, 256  ;;  %v1921_v20 = vadd.s32 4294967294, %v2157_v1 }
  0x89   :  { %342 = vrot.lane.b32.xlu0 %v2196_v11, %s2094_s13 }
  0x9a   :  { %v43_v21 = vpop.permute.xlu0 %42  ;;  %v2226_v23 = vpop.permute.xlu1 %49 }
  0x9b   :  { %vm44_vm2 = vcmp.eq.s32.totalorder %v43_v21, %v1920_v37  ;;  %vm51_vm4 = vcmp.eq.s32.totalorder %v2226_v23, %v1921_v20  ;;  %v444_v23 = vadd.s32 1048576, %v2194_v10 }
  0x9e   :  { %v46_v22 = vpop.permute.xlu0 %45  ;;  %v2230_v25 = vpop.permute.xlu1 %52 }
  0x9f   :  { %vm47_vm1 = vcmp.eq.s32.totalorder %v46_v22, %v1920_v37  ;;  %vm54_vm3 = vcmp.eq.s32.totalorder %v2230_v25, %v1921_v20 }
  0xa2   :  { %v2228_v24 = vpop.permute.xlu0 %56  ;;  %v2234_v27 = vpop.permute.xlu1 %59 }
  0xa6   :  { %v2232_v26 = vpop.permute.xlu0 %63  ;;  %v2238_v29 = vpop.permute.xlu1 %66 }
  0xaa   :  { %v2236_v28 = vpop.permute.xlu0 %70  ;;  %v2242_v31 = vpop.permute.xlu1 %73 }
  0xae   :  { %v2240_v30 = vpop.permute.xlu0 %77  ;;  %v2246_v33 = vpop.permute.xlu1 %80 }
  0xb2   :  { %v2244_v32 = vpop.permute.xlu0 %84 }
  0xec   :  { %v98_v34 = vpop.xlane.xlu0 %97 }
  0xed   :  { %v100_v35 = vcvt.f32.s32 %v98_v34  ;;  %v96_v36 = vpop.xlane.xlu1 %95 }
  0xee   :  { %v99_v38 = vcvt.f32.s32 %v96_v36 }
  0xef   :  { %v101_v39 = vshll.u32 %v100_v35, 16 }
  0xf0   :  { %v111_v40 = vpop.permute.xlu0 %110 }
  0xf1   :  { %v102_v41 = vadd.s32 %v101_v39, %v99_v38  ;;  %v113_v42 = vpop.permute.xlu1 %112 }
  0xf2   :  { %v114_v43 = vsel %vm47_vm1, %v113_v42, 0 }
  0xf3   :  { %v103_v45 = vrot.slane %v102_v41, 4  ;;  %v115_v46 = vsel %vm44_vm2, %v111_v40, %v114_v43 }
  0xf4   :  { %v2252_v47 = vpop.permute.xlu0 %216  ;;  %v116_v48 = vadd.s32 %v115_v46, %v90_v4 }
  0xf5   :  { %v104_v49 = vadd.s32 %v103_v45, %v102_v41 }
  0xf6   :  { %117 = vrot.lane.b32.xlu1 %v116_v48, %s2088_s8 }
  0xf7   :  { %v105_v52 = vrot.slane %v104_v49, 2 }
  0xf8   :  { %v2260_v53 = vpop.permute.xlu0 %230 }
  0xf9   :  { %v106_v54 = vadd.s32 %v105_v52, %v104_v49 }
  0xfa   :  { %223 = vbcast.lane.b32.xlu1 %v221_v50, 256 }
  0xfb   :  { %v107_v57 = vrot.slane %v106_v54, 1 }
  0xfc   :  { %v2267_v58 = vpop.permute.xlu0 %244 }
  0xfd   :  { %v108_v59 = vadd.s32 %v107_v57, %v106_v54 }
  0xfe   :  { %237 = vbcast.lane.b32.xlu1 %v235_v55, 256 }
  0xff   :  { %1928 = vpush %v108_v59 }
 0x100   :  { %v2274_v62 = vpop.permute.xlu0 %258 }
 0x102   :  { %251 = vbcast.lane.b32.xlu1 %v249_v60, 256 }
 0x104   :  { %v343_v4 = vpop.permute.xlu0 %342 }
 0x105   :  { %v344_v5 = vor.u32 %v343_v4, %v341_v63  ;;  %v547_v63 = vadd.s32 1572864, %v2194_v10 }
 0x106   :  { %265 = vbcast.lane.b32.xlu1 %v263_v0, 256 }
 0x107   :  { %v355_v6 = vrot.slane %v344_v5, %v2250_v44  ;;  %v348_v7 = vrot.slane %v344_v5, %v2199_v12  ;;  %v369_v8 = vrot.slane %v344_v5, %v2258_v51  ;;  %v383_v14 = vrot.slane %v344_v5, %v2265_v56 }
 0x108   :  { %v397_v16 = vrot.slane %v344_v5, %v2272_v61  ;;  %v362_v38 = vrot.slane %v344_v5, %v2210_v15  ;;  %v376_v25 = vrot.slane %v344_v5, %v2215_v17  ;;  %v390_v41 = vrot.slane %v344_v5, %v2220_v19 }
 0x109   :  { %357 = vbcast.lane.b32.xlu0 %v355_v6, 256 }
 0x10a   :  { %350 = vbcast.lane.b32.xlu1 %v348_v7, 256 }
 0x10d   :  { %119 = vrot.lane.b32.xlu0 %v116_v48, %s2090_s10 }
 0x111   :  { %371 = vbcast.lane.b32.xlu0 %v369_v8, 256 }
 0x115   :  { %385 = vbcast.lane.b32.xlu0 %v383_v14, 256 }
 0x119   :  { %399 = vbcast.lane.b32.xlu0 %v397_v16, 256 }
 0x11d   :  { %445 = vrot.lane.b32.xlu0 %v2196_v11, %s2096_s15 }
 0x130   :  { %s1929_s20 = spop %1928 }
 0x131   :  { %v1888_v13 = vstv %s1929_s20 }
 0x132   :  { %1889 = vst [vmem:[#allocation8] sm:$0xff] %v1888_v13 }
 0x168   :  { %v118_v22 = vpop.permute.xlu1 %117 }
 0x17b   :  { %v2287_v18 = vpop.permute.xlu0 %357 }
 0x17f   :  { %v120_v21 = vpop.permute.xlu0 %119 }
 0x180   :  { %v121_v34 = vsel %vm54_vm3, %v120_v21, 0 }
 0x181   :  { %v122_v35 = vsel %vm51_vm4, %v118_v22, %v121_v34 }
 0x182   :  { %v2292_v36 = vadd.s32 %v122_v35, %v116_v48 }
 0x183   :  { %v2294_v37 = vpop.permute.xlu0 %371 }
 0x184   :  { %124 = vrot.lane.b32.xlu1 %v2292_v36, %s2093_s12 }
 0x187   :  { %v2299_v39 = vpop.permute.xlu0 %385 }
 0x188   :  { %364 = vbcast.lane.b32.xlu1 %v362_v38, 256  ;;  %v650_v38 = vadd.s32 2097152, %v2194_v10 }
 0x18b   :  { %v2302_v40 = vpop.permute.xlu0 %399 }
 0x18c   :  { %378 = vbcast.lane.b32.xlu1 %v376_v25, 256 }
 0x18f   :  { %v446_v42 = vpop.permute.xlu0 %445 }
 0x190   :  { %v447_v43 = vor.u32 %v446_v42, %v444_v23  ;;  %392 = vbcast.lane.b32.xlu1 %v390_v41, 256 }
 0x192   :  { %v465_v45 = vrot.slane %v447_v43, %v2210_v15  ;;  %v451_v46 = vrot.slane %v447_v43, %v2199_v12  ;;  %v479_v48 = vrot.slane %v447_v43, %v2215_v17  ;;  %v458_v49 = vrot.slane %v447_v43, %v2250_v44 }
 0x193   :  { %v493_v50 = vrot.slane %v447_v43, %v2220_v19  ;;  %v472_v52 = vrot.slane %v447_v43, %v2258_v51  ;;  %v486_v54 = vrot.slane %v447_v43, %v2265_v56  ;;  %v500_v55 = vrot.slane %v447_v43, %v2272_v61 }
 0x194   :  { %467 = vbcast.lane.b32.xlu0 %v465_v45, 256  ;;  %453 = vbcast.lane.b32.xlu1 %v451_v46, 256 }
 0x198   :  { %481 = vbcast.lane.b32.xlu0 %v479_v48, 256  ;;  %460 = vbcast.lane.b32.xlu1 %v458_v49, 256  ;;  %v2350_v49 = vpop.permute.xlu1 %223 }
 0x19c   :  { %495 = vbcast.lane.b32.xlu0 %v493_v50, 256  ;;  %474 = vbcast.lane.b32.xlu1 %v472_v52, 256  ;;  %v2352_v50 = vpop.permute.xlu1 %237 }
 0x1a0   :  { %548 = vrot.lane.b32.xlu0 %v2196_v11, %s2102_s21  ;;  %488 = vbcast.lane.b32.xlu1 %v486_v54, 256  ;;  %v2354_v52 = vpop.permute.xlu1 %251 }
 0x1a4   :  { %502 = vbcast.lane.b32.xlu1 %v500_v55, 256  ;;  %v2356_v54 = vpop.permute.xlu1 %265 }
 0x206   :  { %v2315_v57 = vpop.permute.xlu0 %467 }
 0x20a   :  { %v2317_v59 = vpop.permute.xlu0 %481 }
 0x20e   :  { %v2319_v60 = vpop.permute.xlu0 %495 }
 0x212   :  { %v549_v0 = vpop.permute.xlu0 %548 }
 0x213   :  { %v550_v4 = vor.u32 %v549_v0, %v547_v63  ;;  %v1922_v0 = vadd.s32 4294967292, %v2157_v1 }
 0x215   :  { %v561_v5 = vrot.slane %v550_v4, %v2250_v44  ;;  %v554_v6 = vrot.slane %v550_v4, %v2199_v12  ;;  %v575_v7 = vrot.slane %v550_v4, %v2258_v51  ;;  %v568_v8 = vrot.slane %v550_v4, %v2210_v15 }
 0x216   :  { %v589_v14 = vrot.slane %v550_v4, %v2265_v56  ;;  %v582_v16 = vrot.slane %v550_v4, %v2215_v17  ;;  %v603_v13 = vrot.slane %v550_v4, %v2272_v61  ;;  %v596_v20 = vrot.slane %v550_v4, %v2220_v19  ;;  %v2363_v4 = vpop.permute.xlu1 %350 }
 0x217   :  { %563 = vbcast.lane.b32.xlu0 %v561_v5, 256  ;;  %556 = vbcast.lane.b32.xlu1 %v554_v6, 256  ;;  %vm61_vm5 = vcmp.eq.s32.totalorder %v2234_v27, %v1922_v0  ;;  %vm58_vm6 = vcmp.eq.s32.totalorder %v2228_v24, %v1922_v0 }
 0x21a   :  { %v125_v6 = vpop.permute.xlu1 %124 }
 0x21b   :  { %577 = vbcast.lane.b32.xlu0 %v575_v7, 256  ;;  %570 = vbcast.lane.b32.xlu1 %v568_v8, 256 }
 0x21f   :  { %591 = vbcast.lane.b32.xlu0 %v589_v14, 256  ;;  %584 = vbcast.lane.b32.xlu1 %v582_v16, 256 }
 0x223   :  { %605 = vbcast.lane.b32.xlu0 %v603_v13, 256  ;;  %598 = vbcast.lane.b32.xlu1 %v596_v20, 256  ;;  %v753_v13 = vadd.s32 2621440, %v2194_v10 }
 0x227   :  { %651 = vrot.lane.b32.xlu0 %v2196_v11, %s2098_s17 }
 0x289   :  { %v2332_v21 = vpop.permute.xlu0 %563 }
 0x28d   :  { %v2334_v22 = vpop.permute.xlu0 %577 }
 0x291   :  { %v2336_v34 = vpop.permute.xlu0 %591 }
 0x295   :  { %v2338_v35 = vpop.permute.xlu0 %605 }
 0x296   :  { %3218 = vst [vmem:[#allocation15_spill] sm:$0xff] %v2338_v35 }
 0x299   :  { %v652_v25 = vpop.permute.xlu0 %651 }
 0x29a   :  { %v653_v23 = vor.u32 %v652_v25, %v650_v38 }
 0x29c   :  { %v671_v41 = vrot.slane %v653_v23, %v2210_v15  ;;  %v657_v42 = vrot.slane %v653_v23, %v2199_v12  ;;  %v685_v43 = vrot.slane %v653_v23, %v2215_v17  ;;  %v664_v45 = vrot.slane %v653_v23, %v2250_v44 }
 0x29d   :  { %v678_v46 = vrot.slane %v653_v23, %v2258_v51  ;;  %v699_v48 = vrot.slane %v653_v23, %v2220_v19  ;;  %v692_v20 = vrot.slane %v653_v23, %v2265_v56  ;;  %v706_v25 = vrot.slane %v653_v23, %v2272_v61 }
 0x29e   :  { %673 = vbcast.lane.b32.xlu0 %v671_v41, 256  ;;  %659 = vbcast.lane.b32.xlu1 %v657_v42, 256 }
 0x2a2   :  { %687 = vbcast.lane.b32.xlu0 %v685_v43, 256  ;;  %666 = vbcast.lane.b32.xlu1 %v664_v45, 256 }
 0x2a6   :  { %126 = vrot.lane.b32.xlu0 %v2292_v36, %s2092_s11  ;;  %680 = vbcast.lane.b32.xlu1 %v678_v46, 256 }
 0x2aa   :  { %701 = vbcast.lane.b32.xlu0 %v699_v48, 256 }
 0x2ae   :  { %754 = vrot.lane.b32.xlu0 %v2196_v11, %s2103_s22 }
 0x310   :  { %v2358_v55 = vpop.permute.xlu0 %673 }
 0x311   :  { %3219 = vst [vmem:[#allocation16_spill] sm:$0xff] %v2358_v55 }
 0x314   :  { %v2360_v63 = vpop.permute.xlu0 %687 }
 0x315   :  { %3220 = vst [vmem:[#allocation17_spill] sm:$0xff] %v2360_v63 }
 0x318   :  { %v127_v5 = vpop.permute.xlu0 %126 }
 0x319   :  { %v128_v7 = vsel %vm61_vm5, %v127_v5, 0 }
 0x31a   :  { %v129_v8 = vsel %vm58_vm6, %v125_v6, %v128_v7  ;;  %v856_v7 = vadd.s32 3145728, %v2194_v10 }
 0x31b   :  { %v2368_v14 = vadd.s32 %v129_v8, %v2292_v36 }
 0x31c   :  { %v2370_v16 = vpop.permute.xlu0 %701 }
 0x31d   :  { %3221 = vst [vmem:[#allocation18_spill] sm:$0xff] %v2370_v16  ;;  %131 = vrot.lane.b32.xlu1 %v2368_v14, %s2095_s14 }
 0x320   :  { %v755_v38 = vpop.permute.xlu0 %754 }
 0x321   :  { %v756_v27 = vor.u32 %v755_v38, %v753_v13  ;;  %694 = vbcast.lane.b32.xlu1 %v692_v20, 256 }
 0x323   :  { %v767_v24 = vrot.slane %v756_v27, %v2250_v44  ;;  %v781_v36 = vrot.slane %v756_v27, %v2258_v51  ;;  %v760_v41 = vrot.slane %v756_v27, %v2199_v12  ;;  %v795_v42 = vrot.slane %v756_v27, %v2265_v56 }
 0x324   :  { %v774_v43 = vrot.slane %v756_v27, %v2210_v15  ;;  %v809_v45 = vrot.slane %v756_v27, %v2272_v61  ;;  %v788_v46 = vrot.slane %v756_v27, %v2215_v17  ;;  %v802_v23 = vrot.slane %v756_v27, %v2220_v19 }
 0x325   :  { %769 = vbcast.lane.b32.xlu0 %v767_v24, 256  ;;  %708 = vbcast.lane.b32.xlu1 %v706_v25, 256 }
 0x329   :  { %783 = vbcast.lane.b32.xlu0 %v781_v36, 256  ;;  %762 = vbcast.lane.b32.xlu1 %v760_v41, 256 }
 0x32d   :  { %797 = vbcast.lane.b32.xlu0 %v795_v42, 256  ;;  %776 = vbcast.lane.b32.xlu1 %v774_v43, 256 }
 0x331   :  { %811 = vbcast.lane.b32.xlu0 %v809_v45, 256  ;;  %790 = vbcast.lane.b32.xlu1 %v788_v46, 256 }
 0x335   :  { %857 = vrot.lane.b32.xlu0 %v2196_v11, %s2104_s23  ;;  %804 = vbcast.lane.b32.xlu1 %v802_v23, 256  ;;  %v959_v23 = vadd.s32 3670016, %v2194_v10 }
 0x397   :  { %v2386_v48 = vpop.permute.xlu0 %769 }
 0x398   :  { %3222 = vst [vmem:[#allocation19_spill] sm:$0xff] %v2386_v48 }
 0x39b   :  { %v2388_v0 = vpop.permute.xlu0 %783 }
 0x39c   :  { %3223 = vst [vmem:[#allocation20_spill] sm:$0xff] %v2388_v0  ;;  %v1923_v0 = vadd.s32 4294967288, %v2157_v1 }
 0x39e   :  { %vm68_vm7 = vcmp.eq.s32.totalorder %v2238_v29, %v1923_v0  ;;  %vm65_vm8 = vcmp.eq.s32.totalorder %v2232_v26, %v1923_v0 }
 0x39f   :  { %v2390_v5 = vpop.permute.xlu0 %797 }
 0x3a0   :  { %3224 = vst [vmem:[#allocation21_spill] sm:$0xff] %v2390_v5 }
 0x3a3   :  { %v2392_v6 = vpop.permute.xlu0 %811 }
 0x3a4   :  { %3225 = vst [vmem:[#allocation22_spill] sm:$0xff] %v2392_v6 }
 0x3a7   :  { %v858_v8 = vpop.permute.xlu0 %857 }
 0x3a8   :  { %v859_v13 = vor.u32 %v858_v8, %v856_v7 }
 0x3aa   :  { %v877_v20 = vrot.slane %v859_v13, %v2210_v15  ;;  %v863_v38 = vrot.slane %v859_v13, %v2199_v12  ;;  %v891_v27 = vrot.slane %v859_v13, %v2215_v17  ;;  %v870_v24 = vrot.slane %v859_v13, %v2250_v44 }
 0x3ab   :  { %v905_v25 = vrot.slane %v859_v13, %v2220_v19  ;;  %v884_v36 = vrot.slane %v859_v13, %v2258_v51  ;;  %v898_v41 = vrot.slane %v859_v13, %v2265_v56  ;;  %v912_v42 = vrot.slane %v859_v13, %v2272_v61 }
 0x3ac   :  { %879 = vbcast.lane.b32.xlu0 %v877_v20, 256  ;;  %865 = vbcast.lane.b32.xlu1 %v863_v38, 256 }
 0x3b0   :  { %893 = vbcast.lane.b32.xlu0 %v891_v27, 256  ;;  %872 = vbcast.lane.b32.xlu1 %v870_v24, 256 }
 0x3b4   :  { %907 = vbcast.lane.b32.xlu0 %v905_v25, 256  ;;  %886 = vbcast.lane.b32.xlu1 %v884_v36, 256 }
 0x3b8   :  { %960 = vrot.lane.b32.xlu0 %v2196_v11, %s2105_s24  ;;  %900 = vbcast.lane.b32.xlu1 %v898_v41, 256  ;;  %v2422_v41 = vpop.permute.xlu1 %364 }
 0x3bc   :  { %914 = vbcast.lane.b32.xlu1 %v912_v42, 256  ;;  %v2424_v42 = vpop.permute.xlu1 %378 }
 0x41e   :  { %v2404_v43 = vpop.permute.xlu0 %879 }
 0x41f   :  { %3226 = vst [vmem:[#allocation23_spill] sm:$0xff] %v2404_v43 }
 0x422   :  { %v2406_v45 = vpop.permute.xlu0 %893 }
 0x423   :  { %3227 = vst [vmem:[#allocation24_spill] sm:$0xff] %v2406_v45 }
 0x426   :  { %v2408_v46 = vpop.permute.xlu0 %907 }
 0x427   :  { %3228 = vst [vmem:[#allocation25_spill] sm:$0xff] %v2408_v46 }
 0x42a   :  { %v961_v7 = vpop.permute.xlu0 %960 }
 0x42b   :  { %v962_v8 = vor.u32 %v961_v7, %v959_v23  ;;  %v2426_v23 = vpop.permute.xlu1 %392 }
 0x42d   :  { %v973_v20 = vrot.slane %v962_v8, %v2250_v44  ;;  %v966_v38 = vrot.slane %v962_v8, %v2199_v12  ;;  %v987_v27 = vrot.slane %v962_v8, %v2258_v51  ;;  %v980_v13 = vrot.slane %v962_v8, %v2210_v15 }
 0x42e   :  { %v1001_v24 = vrot.slane %v962_v8, %v2265_v56  ;;  %v994_v25 = vrot.slane %v962_v8, %v2215_v17  ;;  %v1015_v36 = vrot.slane %v962_v8, %v2272_v61 }
 0x42f   :  { %975 = vbcast.lane.b32.xlu0 %v973_v20, 256  ;;  %968 = vbcast.lane.b32.xlu1 %v966_v38, 256  ;;  %v2428_v7 = vpop.permute.xlu1 %453 }
 0x433   :  { %989 = vbcast.lane.b32.xlu0 %v987_v27, 256  ;;  %982 = vbcast.lane.b32.xlu1 %v980_v13, 256  ;;  %v2430_v20 = vpop.permute.xlu1 %460 }
 0x437   :  { %1003 = vbcast.lane.b32.xlu0 %v1001_v24, 256  ;;  %996 = vbcast.lane.b32.xlu1 %v994_v25, 256  ;;  %v2432_v38 = vpop.permute.xlu1 %474 }
 0x43b   :  { %133 = vrot.lane.b32.xlu0 %v2368_v14, %s2094_s13  ;;  %v2434_v27 = vpop.permute.xlu1 %488 }
 0x43f   :  { %1017 = vbcast.lane.b32.xlu0 %v1015_v36, 256  ;;  %v2436_v13 = vpop.permute.xlu1 %502 }
 0x443   :  { %1063 = vrot.lane.b32.xlu0 %v2196_v11, %s2100_s19  ;;  %v2438_v24 = vpop.permute.xlu1 %556 }
 0x447   :  { %v2440_v25 = vpop.permute.xlu1 %570 }
 0x44b   :  { %v2442_v36 = vpop.permute.xlu1 %584 }
 0x44f   :  { %v2444_v3 = vpop.permute.xlu1 %598 }
 0x450   :  { %3229 = vst [vmem:[#allocation26_spill] sm:$0xff] %v2444_v3 }
 0x453   :  { %v2446_v46 = vpop.permute.xlu1 %659 }
 0x454   :  { %3230 = vst [vmem:[#allocation27_spill] sm:$0xff] %v2446_v46 }
 0x457   :  { %v2450_v43 = vpop.permute.xlu1 %666 }
 0x458   :  { %3232 = vst [vmem:[#allocation29_spill] sm:$0xff] %v2450_v43 }
 0x45b   :  { %v2457_v48 = vpop.permute.xlu1 %680 }
 0x45c   :  { %3235 = vst [vmem:[#allocation32_spill] sm:$0xff] %v2457_v48 }
 0x45f   :  { %v132_v63 = vpop.permute.xlu1 %131 }
 0x4a1   :  { %v2448_v45 = vpop.permute.xlu0 %975 }
 0x4a2   :  { %3231 = vst [vmem:[#allocation28_spill] sm:$0xff] %v2448_v45 }
 0x4a5   :  { %v2452_v6 = vpop.permute.xlu0 %989 }
 0x4a6   :  { %3233 = vst [vmem:[#allocation30_spill] sm:$0xff] %v2452_v6  ;;  %v1008_v6 = vrot.slane %v962_v8, %v2220_v19 }
 0x4a9   :  { %v2454_v5 = vpop.permute.xlu0 %1003 }
 0x4aa   :  { %3234 = vst [vmem:[#allocation31_spill] sm:$0xff] %v2454_v5  ;;  %v1062_v5 = vadd.s32 4194304, %v2194_v10 }
 0x4ad   :  { %v134_v16 = vpop.permute.xlu0 %133 }
 0x4ae   :  { %v135_v55 = vsel %vm68_vm7, %v134_v16, 0 }
 0x4af   :  { %v136_v46 = vsel %vm65_vm8, %v132_v63, %v135_v55 }
 0x4b0   :  { %v2462_v45 = vadd.s32 %v136_v46, %v2368_v14 }
 0x4b1   :  { %v2464_v43 = vpop.permute.xlu0 %1017 }
 0x4b2   :  { %3236 = vst [vmem:[#allocation33_spill] sm:$0xff] %v2464_v43  ;;  %138 = vrot.lane.b32.xlu1 %v2462_v45, %s2097_s16 }
 0x4b5   :  { %v1064_v48 = vpop.permute.xlu0 %1063 }
 0x4b6   :  { %v1065_v29 = vor.u32 %v1064_v48, %v1062_v5  ;;  %1010 = vbcast.lane.b32.xlu1 %v1008_v6, 256 }
 0x4b8   :  { %v1083_v26 = vrot.slane %v1065_v29, %v2210_v15  ;;  %v1069_v16 = vrot.slane %v1065_v29, %v2199_v12  ;;  %v1097_v55 = vrot.slane %v1065_v29, %v2215_v17  ;;  %v1076_v63 = vrot.slane %v1065_v29, %v2250_v44 }
 0x4b9   :  { %v1111_v14 = vrot.slane %v1065_v29, %v2220_v19  ;;  %v1090_v0 = vrot.slane %v1065_v29, %v2258_v51  ;;  %v1104_v48 = vrot.slane %v1065_v29, %v2265_v56  ;;  %v1118_v5 = vrot.slane %v1065_v29, %v2272_v61 }
 0x4ba   :  { %1085 = vbcast.lane.b32.xlu0 %v1083_v26, 256  ;;  %1071 = vbcast.lane.b32.xlu1 %v1069_v16, 256  ;;  %v1165_v26 = vadd.s32 4718592, %v2194_v10 }
 0x4be   :  { %1099 = vbcast.lane.b32.xlu0 %v1097_v55, 256  ;;  %1078 = vbcast.lane.b32.xlu1 %v1076_v63, 256 }
 0x4c2   :  { %1113 = vbcast.lane.b32.xlu0 %v1111_v14, 256  ;;  %1092 = vbcast.lane.b32.xlu1 %v1090_v0, 256 }
 0x4c6   :  { %1166 = vrot.lane.b32.xlu0 %v2196_v11, %s2106_s25  ;;  %1106 = vbcast.lane.b32.xlu1 %v1104_v48, 256 }
 0x4ca   :  { %1120 = vbcast.lane.b32.xlu1 %v1118_v5, 256 }
 0x52c   :  { %v2479_v6 = vpop.permute.xlu0 %1085 }
 0x52d   :  { %3237 = vst [vmem:[#allocation34_spill] sm:$0xff] %v2479_v6 }
 0x530   :  { %v2481_v46 = vpop.permute.xlu0 %1099 }
 0x531   :  { %3238 = vst [vmem:[#allocation35_spill] sm:$0xff] %v2481_v46 }
 0x534   :  { %v2483_v8 = vpop.permute.xlu0 %1113 }
 0x535   :  { %3239 = vst [vmem:[#allocation36_spill] sm:$0xff] %v2483_v8 }
 0x538   :  { %v1167_v16 = vpop.permute.xlu0 %1166 }
 0x539   :  { %v1168_v55 = vor.u32 %v1167_v16, %v1165_v26 }
 0x53b   :  { %v1179_v63 = vrot.slane %v1168_v55, %v2250_v44  ;;  %v1172_v14 = vrot.slane %v1168_v55, %v2199_v12  ;;  %v1193_v0 = vrot.slane %v1168_v55, %v2258_v51  ;;  %v1186_v29 = vrot.slane %v1168_v55, %v2210_v15 }
 0x53c   :  { %v1207_v48 = vrot.slane %v1168_v55, %v2265_v56  ;;  %v1200_v5 = vrot.slane %v1168_v55, %v2215_v17  ;;  %v1221_v26 = vrot.slane %v1168_v55, %v2272_v61  ;;  %v1214_v16 = vrot.slane %v1168_v55, %v2220_v19 }
 0x53d   :  { %1181 = vbcast.lane.b32.xlu0 %v1179_v63, 256  ;;  %1174 = vbcast.lane.b32.xlu1 %v1172_v14, 256 }
 0x541   :  { %1195 = vbcast.lane.b32.xlu0 %v1193_v0, 256  ;;  %1188 = vbcast.lane.b32.xlu1 %v1186_v29, 256  ;;  %v1268_v29 = vadd.s32 5242880, %v2194_v10 }
 0x545   :  { %1209 = vbcast.lane.b32.xlu0 %v1207_v48, 256  ;;  %1202 = vbcast.lane.b32.xlu1 %v1200_v5, 256 }
 0x549   :  { %1223 = vbcast.lane.b32.xlu0 %v1221_v26, 256  ;;  %1216 = vbcast.lane.b32.xlu1 %v1214_v16, 256  ;;  %v1371_v26 = vadd.s32 5767168, %v2194_v10 }
 0x54d   :  { %1269 = vrot.lane.b32.xlu0 %v2196_v11, %s2107_s26 }
 0x551   :  { %1372 = vrot.lane.b32.xlu0 %v2196_v11, %s2108_s27 }
 0x555   :  { %1475 = vrot.lane.b32.xlu0 %v2196_v11, %s2099_s18 }
 0x559   :  { %1578 = vrot.lane.b32.xlu0 %v2196_v11, %s2109_s28 }
 0x55d   :  { %1681 = vrot.lane.b32.xlu0 %v2196_v11, %s2097_s16 }
 0x561   :  { %1784 = vrot.lane.b32.xlu0 %v2196_v11, %s2095_s14 }
 0x5af   :  { %v2503_v55 = vpop.permute.xlu0 %1181 }
 0x5b0   :  { %3240 = vst [vmem:[#allocation37_spill] sm:$0xff] %v2503_v55 }
 0x5b3   :  { %v2505_v63 = vpop.permute.xlu0 %1195 }
 0x5b4   :  { %3241 = vst [vmem:[#allocation38_spill] sm:$0xff] %v2505_v63 }
 0x5b7   :  { %v2507_v14 = vpop.permute.xlu0 %1209 }
 0x5b8   :  { %3242 = vst [vmem:[#allocation39_spill] sm:$0xff] %v2507_v14 }
 0x5bb   :  { %v2509_v0 = vpop.permute.xlu0 %1223 }
 0x5bc   :  { %3243 = vst [vmem:[#allocation40_spill] sm:$0xff] %v2509_v0 }
 0x5bf   :  { %v1270_v48 = vpop.permute.xlu0 %1269 }
 0x5c0   :  { %v2512_v5 = vor.u32 %v1270_v48, %v1268_v29 }
 0x5c2   :  { %v1296_v16 = vrot.slane %v2512_v5, %v2258_v51  ;;  %v1275_v11 = vrot.slane %v2512_v5, %v2199_v12  ;;  %v1282_v0 = vrot.slane %v2512_v5, %v2250_v44  ;;  %v1289_v48 = vrot.slane %v2512_v5, %v2210_v15 }
 0x5c3   :  { %v1373_v55 = vpop.permute.xlu0 %1372  ;;  %v1310_v14 = vrot.slane %v2512_v5, %v2265_v56 }
 0x5c4   :  { %1298 = vbcast.lane.b32.xlu0 %v1296_v16, 256  ;;  %1277 = vbcast.lane.b32.xlu1 %v1275_v11, 256  ;;  %v2519_v63 = vor.u32 %v1373_v55, %v1371_v26  ;;  %v1303_v55 = vrot.slane %v2512_v5, %v2215_v17 }
 0x5c6   :  { %v1385_v29 = vrot.slane %v2519_v63, %v2250_v44  ;;  %v1399_v16 = vrot.slane %v2519_v63, %v2258_v51  ;;  %v1413_v26 = vrot.slane %v2519_v63, %v2265_v56 }
 0x5c7   :  { %v1476_v11 = vpop.permute.xlu0 %1475 }
 0x5c8   :  { %140 = vrot.lane.b32.xlu0 %v2462_v45, %s2096_s15  ;;  %1284 = vbcast.lane.b32.xlu1 %v1282_v0, 256  ;;  %v1474_v0 = vadd.s32 6291456, %v2194_v10 }
 0x5cc   :  { %1291 = vbcast.lane.b32.xlu1 %v1289_v48, 256  ;;  %1387 = vbcast.lane.b32.xlu0 %v1385_v29, 256  ;;  %v2538_v29 = vor.u32 %v1476_v11, %v1474_v0  ;;  %v1427_v48 = vrot.slane %v2519_v63, %v2272_v61 }
 0x5ce   :  { %v1516_v8 = vrot.slane %v2538_v29, %v2265_v56  ;;  %v1530_v11 = vrot.slane %v2538_v29, %v2272_v61 }
 0x5d0   :  { %1305 = vbcast.lane.b32.xlu1 %v1303_v55, 256  ;;  %1401 = vbcast.lane.b32.xlu0 %v1399_v16, 256  ;;  %v1488_v16 = vrot.slane %v2538_v29, %v2250_v44  ;;  %v1502_v55 = vrot.slane %v2538_v29, %v2258_v51 }
 0x5d4   :  { %1312 = vbcast.lane.b32.xlu1 %v1310_v14, 256  ;;  %1415 = vbcast.lane.b32.xlu0 %v1413_v26, 256  ;;  %v1577_v14 = vadd.s32 6815744, %v2194_v10  ;;  %v1579_v26 = vpop.permute.xlu0 %1578 }
 0x5d6   :  { %v2549_v0 = vor.u32 %v1579_v26, %v1577_v14 }
 0x5d8   :  { %1429 = vbcast.lane.b32.xlu0 %v1427_v48, 256  ;;  %v1591_v48 = vrot.slane %v2549_v0, %v2250_v44  ;;  %v1619_v46 = vrot.slane %v2549_v0, %v2265_v56  ;;  %v1633_v14 = vrot.slane %v2549_v0, %v2272_v61  ;;  %v1682_v35 = vpop.permute.xlu0 %1681 }
 0x5dc   :  { %1490 = vbcast.lane.b32.xlu0 %v1488_v16, 256  ;;  %v1605_v16 = vrot.slane %v2549_v0, %v2258_v51 }
 0x5e0   :  { %1504 = vbcast.lane.b32.xlu0 %v1502_v55, 256  ;;  %v2557_v55 = vpop.permute.xlu1 %694 }
 0x5e1   :  { %3244 = vst [vmem:[#allocation41_spill] sm:$0xff] %v2557_v55 }
 0x5e4   :  { %1518 = vbcast.lane.b32.xlu0 %v1516_v8, 256  ;;  %v2561_v8 = vpop.permute.xlu1 %708 }
 0x5e5   :  { %3245 = vst [vmem:[#allocation42_spill] sm:$0xff] %v2561_v8 }
 0x5e8   :  { %1532 = vbcast.lane.b32.xlu0 %v1530_v11, 256  ;;  %v2565_v26 = vpop.permute.xlu1 %762 }
 0x5e9   :  { %3246 = vst [vmem:[#allocation43_spill] sm:$0xff] %v2565_v26  ;;  %v1785_v26 = vpop.permute.xlu0 %1784 }
 0x5ec   :  { %1593 = vbcast.lane.b32.xlu0 %v1591_v48, 256  ;;  %v2567_v11 = vpop.permute.xlu1 %776 }
 0x5ed   :  { %3247 = vst [vmem:[#allocation44_spill] sm:$0xff] %v2567_v11 }
 0x5f0   :  { %1607 = vbcast.lane.b32.xlu0 %v1605_v16, 256  ;;  %v2569_v48 = vpop.permute.xlu1 %790 }
 0x5f1   :  { %3248 = vst [vmem:[#allocation45_spill] sm:$0xff] %v2569_v48 }
 0x5f4   :  { %1621 = vbcast.lane.b32.xlu0 %v1619_v46, 256  ;;  %v2571_v6 = vpop.permute.xlu1 %804 }
 0x5f5   :  { %3249 = vst [vmem:[#allocation46_spill] sm:$0xff] %v2571_v6  ;;  %v1924_v6 = vadd.s32 4294967280, %v2157_v1 }
 0x5f7   :  { %vm75_vm9 = vcmp.eq.s32.totalorder %v2242_v31, %v1924_v6  ;;  %vm72_vm10 = vcmp.eq.s32.totalorder %v2236_v28, %v1924_v6  ;;  %v1317_v28 = vrot.slane %v2512_v5, %v2220_v19 }
 0x5f8   :  { %1635 = vbcast.lane.b32.xlu0 %v1633_v14, 256  ;;  %v2573_v43 = vpop.permute.xlu1 %865 }
 0x5f9   :  { %3250 = vst [vmem:[#allocation47_spill] sm:$0xff] %v2573_v43 }
 0x5fc   :  { %v2575_v16 = vpop.permute.xlu1 %872 }
 0x5fd   :  { %3251 = vst [vmem:[#allocation48_spill] sm:$0xff] %v2575_v16  ;;  %v1680_v16 = vadd.s32 7340032, %v2194_v10 }
 0x600   :  { %v2577_v55 = vpop.permute.xlu1 %886 }
 0x601   :  { %3252 = vst [vmem:[#allocation49_spill] sm:$0xff] %v2577_v55 }
 0x604   :  { %v2579_v8 = vpop.permute.xlu1 %900 }
 0x605   :  { %3253 = vst [vmem:[#allocation50_spill] sm:$0xff] %v2579_v8 }
 0x608   :  { %v2581_v46 = vpop.permute.xlu1 %914 }
 0x609   :  { %3254 = vst [vmem:[#allocation51_spill] sm:$0xff] %v2581_v46 }
 0x60c   :  { %v2583_v14 = vpop.permute.xlu1 %968 }
 0x60d   :  { %3255 = vst [vmem:[#allocation52_spill] sm:$0xff] %v2583_v14  ;;  %v2595_v14 = vor.u32 %v1682_v35, %v1680_v16 }
 0x60f   :  { %v1694_v31 = vrot.slane %v2595_v14, %v2250_v44  ;;  %v1708_v35 = vrot.slane %v2595_v14, %v2258_v51  ;;  %v1722_v6 = vrot.slane %v2595_v14, %v2265_v56  ;;  %v1736_v16 = vrot.slane %v2595_v14, %v2272_v61 }
 0x610   :  { %v2585_v3 = vpop.permute.xlu1 %982 }
 0x611   :  { %3256 = vst [vmem:[#allocation53_spill] sm:$0xff] %v2585_v3 }
 0x614   :  { %v2590_v48 = vpop.permute.xlu1 %996 }
 0x618   :  { %v139_v46 = vpop.permute.xlu1 %138 }
 0x636   :  { %v2587_v11 = vpop.permute.xlu0 %1298 }
 0x637   :  { %3257 = vst [vmem:[#allocation54_spill] sm:$0xff] %v2587_v11 }
 0x63a   :  { %v141_v55 = vpop.permute.xlu0 %140 }
 0x63b   :  { %v142_v8 = vsel %vm75_vm9, %v141_v55, 0  ;;  %v1378_v55 = vrot.slane %v2519_v63, %v2199_v12 }
 0x63c   :  { %v143_v43 = vsel %vm72_vm10, %v139_v46, %v142_v8  ;;  %v1406_v46 = vrot.slane %v2519_v63, %v2215_v17 }
 0x63d   :  { %v2598_v3 = vadd.s32 %v143_v43, %v2462_v45  ;;  %v1324_v43 = vrot.slane %v2512_v5, %v2272_v61  ;;  %v1783_v45 = vadd.s32 7864320, %v2194_v10  ;;  %v1392_v5 = vrot.slane %v2519_v63, %v2210_v15 }
 0x63f   :  { %147 = vrot.lane.b32.xlu0 %v2598_v3, %s2098_s17  ;;  %145 = vrot.lane.b32.xlu1 %v2598_v3, %s2099_s18  ;;  %v2617_v8 = vor.u32 %v1785_v26, %v1783_v45 }
 0x641   :  { %3258 = vst [vmem:[#allocation55_spill] sm:$0xff] %v2617_v8  ;;  %v1797_v10 = vrot.slane %v2617_v8, %v2250_v44  ;;  %v1811_v26 = vrot.slane %v2617_v8, %v2258_v51  ;;  %v2635_v44 = vpop.permute.xlu1 %1010  ;;  %v1509_v51 = vrot.slane %v2538_v29, %v2215_v17 }
 0x643   :  { %1696 = vbcast.lane.b32.xlu0 %v1694_v31, 256  ;;  %1319 = vbcast.lane.b32.xlu1 %v1317_v28, 256  ;;  %v1420_v31 = vrot.slane %v2519_v63, %v2220_v19  ;;  %v1825_v28 = vrot.slane %v2617_v8, %v2265_v56  ;;  %v1523_v56 = vrot.slane %v2538_v29, %v2220_v19 }
 0x645   :  { %v2641_v63 = vpop.permute.xlu1 %1071 }
 0x647   :  { %1710 = vbcast.lane.b32.xlu0 %v1708_v35, 256  ;;  %1326 = vbcast.lane.b32.xlu1 %v1324_v43, 256  ;;  %v1481_v35 = vrot.slane %v2538_v29, %v2199_v12  ;;  %v1495_v43 = vrot.slane %v2538_v29, %v2210_v15 }
 0x649   :  { %v2645_v45 = vpop.permute.xlu1 %1078 }
 0x64b   :  { %1724 = vbcast.lane.b32.xlu0 %v1722_v6, 256  ;;  %1380 = vbcast.lane.b32.xlu1 %v1378_v55, 256  ;;  %v1584_v6 = vrot.slane %v2549_v0, %v2199_v12  ;;  %v2649_v55 = vpop.permute.xlu0 %1387 }
 0x64c   :  { %3259 = vst [vmem:[#allocation56_spill] sm:$0xff] %v2649_v55 }
 0x64f   :  { %1738 = vbcast.lane.b32.xlu0 %v1736_v16, 256  ;;  %1394 = vbcast.lane.b32.xlu1 %v1392_v5, 256  ;;  %v1598_v16 = vrot.slane %v2549_v0, %v2210_v15  ;;  %v2653_v5 = vpop.permute.xlu1 %1092 }
 0x653   :  { %1799 = vbcast.lane.b32.xlu0 %v1797_v10, 256  ;;  %1408 = vbcast.lane.b32.xlu1 %v1406_v46, 256  ;;  %v1612_v10 = vrot.slane %v2549_v0, %v2215_v17  ;;  %v2657_v46 = vpop.permute.xlu0 %1401  ;;  %v2659_v29 = vpop.permute.xlu1 %1106 }
 0x654   :  { %3260 = vst [vmem:[#allocation57_spill] sm:$0xff] %v2657_v46 }
 0x657   :  { %1813 = vbcast.lane.b32.xlu0 %v1811_v26, 256  ;;  %1422 = vbcast.lane.b32.xlu1 %v1420_v31, 256  ;;  %v1626_v26 = vrot.slane %v2549_v0, %v2220_v19  ;;  %v2663_v31 = vpop.permute.xlu0 %1415 }
 0x658   :  { %3261 = vst [vmem:[#allocation58_spill] sm:$0xff] %v2663_v31 }
 0x65b   :  { %1827 = vbcast.lane.b32.xlu0 %v1825_v28, 256  ;;  %1483 = vbcast.lane.b32.xlu1 %v1481_v35, 256  ;;  %v2665_v28 = vpop.permute.xlu1 %1120  ;;  %v2667_v35 = vpop.permute.xlu0 %1429 }
 0x65c   :  { %3262 = vst [vmem:[#allocation59_spill] sm:$0xff] %v2667_v35 }
 0x65f   :  { %1497 = vbcast.lane.b32.xlu1 %v1495_v43, 256  ;;  %v2669_v43 = vpop.permute.xlu1 %1174 }
 0x660   :  { %3263 = vst [vmem:[#allocation60_spill] sm:$0xff] %v2669_v43 }
 0x663   :  { %1511 = vbcast.lane.b32.xlu1 %v1509_v51, 256  ;;  %v2671_v51 = vpop.permute.xlu0 %1490 }
 0x664   :  { %3264 = vst [vmem:[#allocation61_spill] sm:$0xff] %v2671_v51 }
 0x667   :  { %1525 = vbcast.lane.b32.xlu1 %v1523_v56, 256  ;;  %v2673_v56 = vpop.permute.xlu1 %1188 }
 0x668   :  { %3265 = vst [vmem:[#allocation62_spill] sm:$0xff] %v2673_v56 }
 0x66b   :  { %1586 = vbcast.lane.b32.xlu1 %v1584_v6, 256  ;;  %v2675_v6 = vpop.permute.xlu0 %1504 }
 0x66c   :  { %3266 = vst [vmem:[#allocation63_spill] sm:$0xff] %v2675_v6 }
 0x66f   :  { %1600 = vbcast.lane.b32.xlu1 %v1598_v16, 256  ;;  %v2677_v16 = vpop.permute.xlu1 %1202 }
 0x670   :  { %3267 = vst [vmem:[#allocation64_spill] sm:$0xff] %v2677_v16 }
 0x673   :  { %1614 = vbcast.lane.b32.xlu1 %v1612_v10, 256  ;;  %v2679_v10 = vpop.permute.xlu0 %1518  ;;  %v2681_v0 = vpop.permute.xlu1 %1216 }
 0x674   :  { %3268 = vst [vmem:[#allocation65_spill] sm:$0xff] %v2679_v10  ;;  %3269 = vst [vmem:[#allocation66_spill] sm:$0xff] %v2681_v0 }
 0x677   :  { %1628 = vbcast.lane.b32.xlu1 %v1626_v26, 256  ;;  %v2683_v26 = vpop.permute.xlu1 %1277  ;;  %v2685_v55 = vpop.permute.xlu0 %1532 }
 0x678   :  { %3270 = vst [vmem:[#allocation67_spill] sm:$0xff] %v2683_v26  ;;  %3271 = vst [vmem:[#allocation68_spill] sm:$0xff] %v2685_v55  ;;  %v1925_v26 = vadd.s32 4294967264, %v2157_v1 }
 0x67a   :  { %vm82_vm11 = vcmp.eq.s32.totalorder %v2246_v33, %v1925_v26  ;;  %vm79_vm12 = vcmp.eq.s32.totalorder %v2240_v30, %v1925_v26  ;;  %v1715_v33 = vrot.slane %v2595_v14, %v2215_v17  ;;  %v1729_v30 = vrot.slane %v2595_v14, %v2220_v19 }
 0x67b   :  { %v2687_v31 = vpop.permute.xlu1 %1284  ;;  %v2689_v46 = vpop.permute.xlu0 %1593 }
 0x67c   :  { %3272 = vst [vmem:[#allocation69_spill] sm:$0xff] %v2687_v31  ;;  %3273 = vst [vmem:[#allocation70_spill] sm:$0xff] %v2689_v46 }
 0x67f   :  { %v2691_v35 = vpop.permute.xlu1 %1291  ;;  %v2693_v61 = vpop.permute.xlu0 %1607 }
 0x680   :  { %3274 = vst [vmem:[#allocation71_spill] sm:$0xff] %v2691_v35  ;;  %3275 = vst [vmem:[#allocation72_spill] sm:$0xff] %v2693_v61 }
 0x683   :  { %v2695_v51 = vpop.permute.xlu1 %1305  ;;  %v2697_v6 = vpop.permute.xlu0 %1621 }
 0x684   :  { %3276 = vst [vmem:[#allocation73_spill] sm:$0xff] %v2695_v51  ;;  %3277 = vst [vmem:[#allocation74_spill] sm:$0xff] %v2697_v6  ;;  %v1687_v6 = vrot.slane %v2595_v14, %v2199_v12  ;;  %v1989_v51 = vld [vmem:[#allocation2] sm:$0xff] }
 0x687   :  { %v2699_v11 = vpop.permute.xlu1 %1312  ;;  %v2701_v10 = vpop.permute.xlu0 %1635 }
 0x688   :  { %3278 = vst [vmem:[#allocation75_spill] sm:$0xff] %v2699_v11  ;;  %3279 = vst [vmem:[#allocation76_spill] sm:$0xff] %v2701_v10  ;;  %v1701_v10 = vrot.slane %v2595_v14, %v2210_v15 }
 0x6b1   :  { %v148_v55 = vpop.permute.xlu0 %147  ;;  %v146_v31 = vpop.permute.xlu1 %145 }
 0x6b2   :  { %v149_v46 = vsel %vm82_vm11, %v148_v55, 0  ;;  %v1804_v55 = vrot.slane %v2617_v8, %v2210_v15 }
 0x6b3   :  { %v150_v35 = vsel %vm79_vm12, %v146_v31, %v149_v46  ;;  %v1818_v46 = vrot.slane %v2617_v8, %v2215_v17  ;;  %v1832_v31 = vrot.slane %v2617_v8, %v2220_v19 }
 0x6b4   :  { %v151_v61 = vadd.s32 %v150_v35, %v2598_v3  ;;  %v1790_v3 = vrot.slane %v2617_v8, %v2199_v12 }
 0x6b5   :  { %v2724_v35 = vpop.permute.xlu1 %1319 }
 0x6b6   :  { %152 = vrot.lane.b32.xlu1 %v151_v61, %s2100_s19  ;;  %3280 = vst [vmem:[#allocation77_spill] sm:$0xff] %v2724_v35 }
 0x6b9   :  { %v2726_v14 = vpop.permute.xlu1 %1326 }
 0x6ba   :  { %1689 = vbcast.lane.b32.xlu1 %v1687_v6, 256  ;;  %3281 = vst [vmem:[#allocation78_spill] sm:$0xff] %v2726_v14 }
 0x6bd   :  { %v2728_v6 = vpop.permute.xlu1 %1380 }
 0x6be   :  { %1703 = vbcast.lane.b32.xlu1 %v1701_v10, 256  ;;  %3282 = vst [vmem:[#allocation79_spill] sm:$0xff] %v2728_v6 }
 0x6c1   :  { %v2730_v10 = vpop.permute.xlu1 %1394 }
 0x6c2   :  { %1717 = vbcast.lane.b32.xlu1 %v1715_v33, 256  ;;  %3283 = vst [vmem:[#allocation80_spill] sm:$0xff] %v2730_v10  ;;  %v1926_v10 = vadd.s32 4294967232, %v2157_v1 }
 0x6c4   :  { %vm86_vm13 = vcmp.eq.s32.totalorder %v2244_v32, %v1926_v10 }
 0x6c5   :  { %v2732_v26 = vpop.permute.xlu1 %1408 }
 0x6c6   :  { %1731 = vbcast.lane.b32.xlu1 %v1729_v30, 256  ;;  %3284 = vst [vmem:[#allocation81_spill] sm:$0xff] %v2732_v26 }
 0x6c9   :  { %v2734_v15 = vpop.permute.xlu1 %1422 }
 0x6ca   :  { %1792 = vbcast.lane.b32.xlu1 %v1790_v3, 256  ;;  %3285 = vst [vmem:[#allocation82_spill] sm:$0xff] %v2734_v15  ;;  %v2110_v15 = vmov 1966171168  }
 0x6cb   :  { %v162_v8 = vunpack.c.l.s4 %v2110_v15 }
 0x6cd   :  { %v2736_v33 = vpop.permute.xlu1 %1483 }
 0x6ce   :  { %1806 = vbcast.lane.b32.xlu1 %v1804_v55, 256  ;;  %3286 = vst [vmem:[#allocation83_spill] sm:$0xff] %v2736_v33  ;;  %v163_v33 = vunpack.c.0.s8 %v162_v8 }
 0x6d1   :  { %v2738_v17 = vpop.permute.xlu1 %1497 }
 0x6d2   :  { %1820 = vbcast.lane.b32.xlu1 %v1818_v46, 256  ;;  %3287 = vst [vmem:[#allocation84_spill] sm:$0xff] %v2738_v17  ;;  %v2748_v46 = vpop.permute.xlu0 %1696 }
 0x6d5   :  { %v2740_v30 = vpop.permute.xlu1 %1511 }
 0x6d6   :  { %1834 = vbcast.lane.b32.xlu1 %v1832_v31, 256  ;;  %3288 = vst [vmem:[#allocation85_spill] sm:$0xff] %v2740_v30  ;;  %v2752_v6 = vpop.permute.xlu0 %1710 }
 0x6d9   :  { %v2742_v19 = vpop.permute.xlu1 %1525 }
 0x6da   :  { %3289 = vst [vmem:[#allocation86_spill] sm:$0xff] %v2742_v19  ;;  %v1725_v19 = vpop.permute.xlu0 %1724 }
 0x6dd   :  { %v2744_v3 = vpop.permute.xlu1 %1586 }
 0x6de   :  { %3290 = vst [vmem:[#allocation87_spill] sm:$0xff] %v2744_v3  ;;  %v1739_v11 = vpop.permute.xlu0 %1738 }
 0x6e1   :  { %v2746_v55 = vpop.permute.xlu1 %1600 }
 0x6e2   :  { %3291 = vst [vmem:[#allocation88_spill] sm:$0xff] %v2746_v55  ;;  %v1800_v10 = vpop.permute.xlu0 %1799 }
 0x6e5   :  { %v2750_v31 = vpop.permute.xlu1 %1614 }
 0x6e6   :  { %3292 = vst [vmem:[#allocation89_spill] sm:$0xff] %v2750_v31  ;;  %v166_v31 = vsub.s32 %v163_v33, %v2191_v9 }
 0x6e9   :  { %v2754_v26 = vpop.permute.xlu1 %1628 }
 0x6ea   :  { %3293 = vst [vmem:[#allocation90_spill] sm:$0xff] %v2754_v26 }
 0x728   :  { %v153_v30 = vpop.permute.xlu1 %152 }
 0x729   :  { %v154_v17 = vsel %vm86_vm13, %v153_v30, 0 }
 0x72a   :  { %v155_v3 = vadd.s32 %v154_v17, %v151_v61 }
 0x72c   :  { %v1927_v55 = vadd.s32 4294967295, %v155_v3  ;;  %v1690_v14 = vpop.permute.xlu1 %1689 }
 0x72e   :  { %v157_v35 = vshll.u32 %v1927_v55, 16 }
 0x730   :  { %v158_v0 = vor.u32 %v1989_v51, %v157_v35  ;;  %v1704_v26 = vpop.permute.xlu1 %1703 }
 0x732   :  { %v159_v1 = vsel %vm89_vm0, %v158_v0, 4294967295 }
 0x733   :  { %v160_v15 = vcombine.high %v159_v1, %v159_v1  ;;  %v167_v16 = vrot.slane %v159_v1, %v166_v31 }
 0x734   :  { %v1718_v32 = vpop.permute.xlu1 %1717 }
 0x735   :  { %v174_v56 = vrot.slane %v160_v15, %v166_v31  ;;  %v175_v30 = vcombine.high %v167_v16, %v167_v16  ;;  %v183_v61 = vrot.slane %v167_v16, %v166_v31  ;;  %v2773_v16 = vpop.permute.xlu0 %1813 }
 0x736   :  { %3294 = vst [vmem:[#allocation91_spill] sm:$0xff] %v2773_v16 }
 0x737   :  { %v176_v8 = vcombine.high %v174_v56, %v174_v56  ;;  %v190_v17 = vrot.slane %v174_v56, %v166_v31  ;;  %v197_v3 = vrot.slane %v175_v30, %v166_v31  ;;  %v205_v55 = vcombine.high %v183_v61, %v183_v61 }
 0x738   :  { %v2762_v43 = vrot.slane %v183_v61, %v2199_v12  ;;  %v1732_v9 = vpop.permute.xlu1 %1731 }
 0x739   :  { %v204_v51 = vrot.slane %v176_v8, %v166_v31  ;;  %v206_v35 = vcombine.high %v190_v17, %v190_v17  ;;  %v207_v33 = vcombine.high %v197_v3, %v197_v3  ;;  %v2765_v2 = vrot.slane %v197_v3, %v2199_v12 }
 0x73a   :  { %v2768_v0 = vrot.slane %v205_v55, %v2199_v12  ;;  %v2771_v1 = vrot.slane %v190_v17, %v2199_v12  ;;  %vm1740_vm14 = vcmp.eq.s32.totalorder %v2762_v43, %v1690_v14  ;;  %v3295_v17 = vmov 0  }
 0x73b   :  { %v208_v56 = vcombine.high %v204_v51, %v204_v51  ;;  %v2776_v15 = vrot.slane %v207_v33, %v2199_v12  ;;  %v2779_v30 = vrot.slane %v204_v51, %v2199_v12  ;;  %v2782_v31 = vrot.slane %v206_v35, %v2199_v12 }
 0x73c   :  { %v1793_v61 = vpop.permute.xlu1 %1792  ;;  %vm1742_vm15 = vcmp.eq.s32.totalorder %v2768_v0, %v1704_v26  ;;  %vm1741_vm1 = vcmp.eq.s32.totalorder %v2765_v2, %v2748_v46  ;;  %vm1744_vm2 = vcmp.eq.s32.totalorder %v2771_v1, %v1718_v32  ;;  %v1748_v14 = vsel %vm1740_vm14, 1, %v3295_v17 }
 0x73d   :  { %v2786_v8 = vrot.slane %v208_v56, %v2199_v12  ;;  %vm1745_vm0 = vcmp.eq.s32.totalorder %v2779_v30, %v1725_v19  ;;  %vm1743_vm3 = vcmp.eq.s32.totalorder %v2776_v15, %v2752_v6  ;;  %vm1746_vm4 = vcmp.eq.s32.totalorder %v2782_v31, %v1732_v9  ;;  %v1828_v6 = vpop.permute.xlu0 %1827 }
 0x73e   :  { %v1753_v3 = vsel %vm1745_vm0, 1, %v3295_v17  ;;  %vm299_vm6 = vcmp.eq.s32.totalorder %v2762_v43, %v2252_v47  ;;  %v1750_v12 = vsel %vm1742_vm15, 1, %v3295_v17  ;;  %v1754_v19 = vsel %vm1746_vm4, 1, %v3295_v17 }
 0x73f   :  { %vm1747_vm5 = vcmp.eq.s32.totalorder %v2786_v8, %v1739_v11  ;;  %vm1844_vm7 = vcmp.eq.s32.totalorder %v2765_v2, %v1800_v10  ;;  %v1749_v32 = vsel %vm1741_vm1, 1, %v3295_v17  ;;  %v1752_v55 = vsel %vm1744_vm2, 1, %v3295_v17 }
 0x740   :  { %v1755_v26 = vsel %vm1747_vm5, 1, %v3295_v17  ;;  %v2804_v46 = vpop.permute.xlu1 %1806  ;;  %v1751_v11 = vsel %vm1743_vm3, 1, %v3295_v17  ;;  %vm1843_vm8 = vcmp.eq.s32.totalorder %v2762_v43, %v1793_v61  ;;  %v2811_v9 = vadd.s32 %v1753_v3, %v1749_v32 }
 0x741   :  { %v1759_v51 = vadd.s32 %v1755_v26, %v1751_v11  ;;  %v1758_v35 = vadd.s32 %v1754_v19, %v1750_v12  ;;  %vm1848_vm9 = vcmp.eq.s32.totalorder %v2779_v30, %v1828_v6  ;;  %v1852_v33 = vsel %vm1844_vm7, 1, %v3295_v17 }
 0x742   :  { %v1856_v56 = vsel %vm1848_vm9, 1, %v3295_v17  ;;  %vm300_vm10 = vcmp.eq.s32.totalorder %v2765_v2, %v2350_v49  ;;  %vm301_vm11 = vcmp.eq.s32.totalorder %v2768_v0, %v2260_v53  ;;  %v1851_v10 = vsel %vm1843_vm8, 1, %v3295_v17 }
 0x743   :  { %v1860_v16 = vadd.s32 %v1856_v56, %v1852_v33  ;;  %vm303_vm12 = vcmp.eq.s32.totalorder %v2771_v1, %v2267_v58  ;;  %vm304_vm13 = vcmp.eq.s32.totalorder %v2779_v30, %v2354_v52  ;;  %vm302_vm15 = vcmp.eq.s32.totalorder %v2776_v15, %v2352_v50 }
 0x744   :  { %v1821_v61 = vpop.permute.xlu1 %1820  ;;  %vm305_vm0 = vcmp.eq.s32.totalorder %v2782_v31, %v2274_v62  ;;  %vm306_vm1 = vcmp.eq.s32.totalorder %v2786_v8, %v2356_v54  ;;  %v307_v58 = vsel %vm299_vm6, 1, %v3295_v17  ;;  %v308_v49 = vsel %vm300_vm10, 1, %v3295_v17 }
 0x745   :  { %vm1847_vm14 = vcmp.eq.s32.totalorder %v2771_v1, %v1821_v61  ;;  %v309_v52 = vsel %vm301_vm11, 1, %v3295_v17  ;;  %v311_v50 = vsel %vm303_vm12, 1, %v3295_v17  ;;  %v312_v12 = vsel %vm304_vm13, 1, %v3295_v17 }
 0x746   :  { %v1855_v53 = vsel %vm1847_vm14, 1, %v3295_v17  ;;  %v313_v62 = vsel %vm305_vm0, 1, %v3295_v17  ;;  %v310_v54 = vsel %vm302_vm15, 1, %v3295_v17  ;;  %v314_v26 = vsel %vm306_vm1, 1, %v3295_v17 }
 0x747   :  { %v1859_v3 = vadd.s32 %v1855_v53, %v1851_v10  ;;  %v315_v19 = vadd.s32 %v311_v50, %v307_v58  ;;  %v316_v6 = vadd.s32 %v312_v12, %v308_v49  ;;  %v317_v47 = vadd.s32 %v313_v62, %v309_v52 }
 0x748   :  { %v318_v11 = vadd.s32 %v314_v26, %v310_v54  ;;  %vm401_vm2 = vcmp.eq.s32.totalorder %v2762_v43, %v2363_v4  ;;  %v2848_v33 = vadd.s32 %v1752_v55, %v1748_v14  ;;  %v2850_v56 = vadd.s32 %v1759_v51, %v1758_v35 }
 0x749   :  { %v2844_v32 = vadd.s32 %v1860_v16, %v1859_v3  ;;  %vm402_vm3 = vcmp.eq.s32.totalorder %v2765_v2, %v2287_v18  ;;  %vm403_vm4 = vcmp.eq.s32.totalorder %v2768_v0, %v2422_v41  ;;  %v319_v10 = vadd.s32 %v316_v6, %v315_v19 }
 0x74a   :  { %v320_v61 = vadd.s32 %v318_v11, %v317_v47  ;;  %vm404_vm5 = vcmp.eq.s32.totalorder %v2776_v15, %v2294_v37  ;;  %vm405_vm6 = vcmp.eq.s32.totalorder %v2771_v1, %v2424_v42  ;;  %vm406_vm7 = vcmp.eq.s32.totalorder %v2779_v30, %v2299_v39 }
 0x74b   :  { %vm407_vm8 = vcmp.eq.s32.totalorder %v2782_v31, %v2426_v23  ;;  %vm408_vm9 = vcmp.eq.s32.totalorder %v2786_v8, %v2302_v40  ;;  %v409_v18 = vsel %vm401_vm2, 1, %v3295_v17  ;;  %v410_v41 = vsel %vm402_vm3, 1, %v3295_v17 }
 0x74c   :  { %v321_v4 = vadd.s32 %v320_v61, %v319_v10  ;;  %v411_v16 = vsel %vm403_vm4, 1, %v3295_v17  ;;  %v412_v37 = vsel %vm404_vm5, 1, %v3295_v17  ;;  %v413_v42 = vsel %vm405_vm6, 1, %v3295_v17 }
 0x74d   :  { %v414_v14 = vsel %vm406_vm7, 1, %v3295_v17  ;;  %v415_v39 = vsel %vm407_vm8, 1, %v3295_v17  ;;  %v416_v23 = vsel %vm408_vm9, 1, %v3295_v17  ;;  %v417_v40 = vadd.s32 %v413_v42, %v409_v18 }
 0x74e   :  { %v323_v55 = vshrl.u32 %v321_v4, 16  ;;  %v322_v51 = vand.u32 65535, %v321_v4  ;;  %v418_v35 = vadd.s32 %v414_v14, %v410_v41  ;;  %v419_v53 = vadd.s32 %v415_v39, %v411_v16 }
 0x74f   :  { %v420_v58 = vadd.s32 %v416_v23, %v412_v37  ;;  %vm504_vm10 = vcmp.eq.s32.totalorder %v2762_v43, %v2428_v7  ;;  %vm505_vm11 = vcmp.eq.s32.totalorder %v2765_v2, %v2430_v20  ;;  %vm506_vm12 = vcmp.eq.s32.totalorder %v2768_v0, %v2315_v57 }
 0x750   :  { %v325_v49 = vcvt.s32.f32 %v323_v55  ;;  %v324_v52 = vcvt.s32.f32 %v322_v51  ;;  %v421_v3 = vadd.s32 %v418_v35, %v417_v40  ;;  %vm507_vm13 = vcmp.eq.s32.totalorder %v2776_v15, %v2432_v38 }
 0x751   :  { %v422_v50 = vadd.s32 %v420_v58, %v419_v53  ;;  %vm508_vm14 = vcmp.eq.s32.totalorder %v2771_v1, %v2317_v59  ;;  %vm509_vm15 = vcmp.eq.s32.totalorder %v2779_v30, %v2434_v27  ;;  %vm510_vm0 = vcmp.eq.s32.totalorder %v2782_v31, %v2319_v60  ;;  %v3298_v53 = vld [vmem:[#allocation27_spill] sm:$0xff]  ;;  %v3299_v58 = vld [vmem:[#allocation29_spill] sm:$0xff] }
 0x752   :  { %328 = vadd.xlane.f32.xlu1 %v325_v49  ;;  %326 = vadd.xlane.f32.xlu0 %v324_v52  ;;  %vm511_vm1 = vcmp.eq.s32.totalorder %v2786_v8, %v2436_v13  ;;  %v512_v57 = vsel %vm504_vm10, 1, %v3295_v17  ;;  %v513_v7 = vsel %vm505_vm11, 1, %v3295_v17  ;;  %v514_v38 = vsel %vm506_vm12, 1, %v3295_v17  ;;  %v3300_v49 = vld [vmem:[#allocation16_spill] sm:$0xff] }
 0x753   :  { %v423_v20 = vadd.s32 %v422_v50, %v421_v3  ;;  %v515_v59 = vsel %vm507_vm13, 1, %v3295_v17  ;;  %v516_v12 = vsel %vm508_vm14, 1, %v3295_v17  ;;  %v517_v27 = vsel %vm509_vm15, 1, %v3295_v17 }
 0x754   :  { %v518_v62 = vsel %vm510_vm0, 1, %v3295_v17  ;;  %v519_v60 = vsel %vm511_vm1, 1, %v3295_v17  ;;  %v520_v54 = vadd.s32 %v516_v12, %v512_v57  ;;  %v521_v19 = vadd.s32 %v517_v27, %v513_v7  ;;  %v3301_v57 = vld [vmem:[#allocation32_spill] sm:$0xff]  ;;  %v3302_v7 = vld [vmem:[#allocation17_spill] sm:$0xff] }
 0x755   :  { %v424_v26 = vand.u32 65535, %v423_v20  ;;  %v425_v13 = vshrl.u32 %v423_v20, 16  ;;  %v522_v6 = vadd.s32 %v518_v62, %v514_v38  ;;  %v523_v47 = vadd.s32 %v519_v60, %v515_v59  ;;  %v3303_v20 = vld [vmem:[#allocation41_spill] sm:$0xff]  ;;  %v3304_v38 = vld [vmem:[#allocation18_spill] sm:$0xff] }
 0x756   :  { %vm607_vm2 = vcmp.eq.s32.totalorder %v2762_v43, %v2438_v24  ;;  %vm608_vm3 = vcmp.eq.s32.totalorder %v2765_v2, %v2332_v21  ;;  %vm609_vm4 = vcmp.eq.s32.totalorder %v2768_v0, %v2440_v25  ;;  %v524_v61 = vadd.s32 %v521_v19, %v520_v54  ;;  %v3296_v24 = vld [vmem:[#allocation26_spill] sm:$0xff]  ;;  %v3297_v21 = vld [vmem:[#allocation15_spill] sm:$0xff] }
 0x757   :  { %v426_v11 = vcvt.s32.f32 %v424_v26  ;;  %v427_v10 = vcvt.s32.f32 %v425_v13  ;;  %vm610_vm5 = vcmp.eq.s32.totalorder %v2776_v15, %v2334_v22  ;;  %v525_v18 = vadd.s32 %v523_v47, %v522_v6  ;;  %v3305_v59 = vld [vmem:[#allocation42_spill] sm:$0xff] }
 0x758   :  { %vm611_vm6 = vcmp.eq.s32.totalorder %v2771_v1, %v2442_v36  ;;  %vm612_vm7 = vcmp.eq.s32.totalorder %v2779_v30, %v2336_v34  ;;  %vm613_vm8 = vcmp.eq.s32.totalorder %v2782_v31, %v3296_v24  ;;  %vm614_vm9 = vcmp.eq.s32.totalorder %v2786_v8, %v3297_v21  ;;  %v3306_v21 = vld [vmem:[#allocation43_spill] sm:$0xff] }
 0x759   :  { %428 = vadd.xlane.f32.xlu1 %v426_v11  ;;  %430 = vadd.xlane.f32.xlu0 %v427_v10  ;;  %v615_v25 = vsel %vm607_vm2, 1, %v3295_v17  ;;  %v616_v4 = vsel %vm608_vm3, 1, %v3295_v17  ;;  %v617_v22 = vsel %vm609_vm4, 1, %v3295_v17  ;;  %v526_v41 = vadd.s32 %v525_v18, %v524_v61 }
 0x75a   :  { %v618_v36 = vsel %vm610_vm5, 1, %v3295_v17  ;;  %v619_v16 = vsel %vm611_vm6, 1, %v3295_v17  ;;  %v620_v34 = vsel %vm612_vm7, 1, %v3295_v17  ;;  %v621_v37 = vsel %vm613_vm8, 1, %v3295_v17 }
 0x75b   :  { %v622_v42 = vsel %vm614_vm9, 1, %v3295_v17  ;;  %v623_v14 = vadd.s32 %v619_v16, %v615_v25  ;;  %v624_v39 = vadd.s32 %v620_v34, %v616_v4  ;;  %v528_v23 = vshrl.u32 %v526_v41, 16  ;;  %v3309_v34 = vld [vmem:[#allocation20_spill] sm:$0xff] }
 0x75c   :  { %v527_v55 = vand.u32 65535, %v526_v41  ;;  %v625_v51 = vadd.s32 %v621_v37, %v617_v22  ;;  %v626_v40 = vadd.s32 %v622_v42, %v618_v36  ;;  %vm710_vm10 = vcmp.eq.s32.totalorder %v2762_v43, %v3298_v53  ;;  %v3307_v22 = vld [vmem:[#allocation19_spill] sm:$0xff]  ;;  %v3308_v41 = vld [vmem:[#allocation44_spill] sm:$0xff]  ;;  %v3310_v37 = vld [vmem:[#allocation45_spill] sm:$0xff] }
 0x75d   :  { %v627_v35 = vadd.s32 %v624_v39, %v623_v14  ;;  %vm711_vm11 = vcmp.eq.s32.totalorder %v2765_v2, %v3299_v58  ;;  %vm712_vm12 = vcmp.eq.s32.totalorder %v2768_v0, %v3300_v49  ;;  %v530_v52 = vcvt.s32.f32 %v528_v23  ;;  %v3311_v42 = vld [vmem:[#allocation21_spill] sm:$0xff]  ;;  %v3312_v14 = vld [vmem:[#allocation46_spill] sm:$0xff] }
 0x75e   :  { %v529_v3 = vcvt.s32.f32 %v527_v55  ;;  %v628_v50 = vadd.s32 %v626_v40, %v625_v51  ;;  %vm713_vm13 = vcmp.eq.s32.totalorder %v2776_v15, %v3301_v57  ;;  %vm714_vm14 = vcmp.eq.s32.totalorder %v2771_v1, %v3302_v7  ;;  %v3313_v39 = vld [vmem:[#allocation22_spill] sm:$0xff] }
 0x75f   :  { %vm715_vm15 = vcmp.eq.s32.totalorder %v2779_v30, %v3303_v20  ;;  %vm716_vm0 = vcmp.eq.s32.totalorder %v2782_v31, %v3304_v38  ;;  %vm717_vm1 = vcmp.eq.s32.totalorder %v2786_v8, %v3305_v59  ;;  %533 = vadd.xlane.f32.xlu1 %v530_v52  ;;  %v718_v27 = vsel %vm710_vm10, 1, %v3295_v17  ;;  %v3314_v59 = vld [vmem:[#allocation47_spill] sm:$0xff] }
 0x760   :  { %531 = vadd.xlane.f32.xlu0 %v529_v3  ;;  %v629_v12 = vadd.s32 %v628_v50, %v627_v35  ;;  %v719_v62 = vsel %vm711_vm11, 1, %v3295_v17  ;;  %v720_v60 = vsel %vm712_vm12, 1, %v3295_v17  ;;  %v721_v54 = vsel %vm713_vm13, 1, %v3295_v17 }
 0x761   :  { %v722_v26 = vsel %vm714_vm14, 1, %v3295_v17  ;;  %v723_v13 = vsel %vm715_vm15, 1, %v3295_v17  ;;  %v724_v19 = vsel %vm716_vm0, 1, %v3295_v17  ;;  %v725_v11 = vsel %vm717_vm1, 1, %v3295_v17 }
 0x762   :  { %v630_v6 = vand.u32 65535, %v629_v12  ;;  %v631_v47 = vshrl.u32 %v629_v12, 16  ;;  %v726_v10 = vadd.s32 %v722_v26, %v718_v27  ;;  %v727_v61 = vadd.s32 %v723_v13, %v719_v62  ;;  %v3315_v12 = vld [vmem:[#allocation48_spill] sm:$0xff]  ;;  %v3317_v13 = vld [vmem:[#allocation49_spill] sm:$0xff] }
 0x763   :  { %v728_v18 = vadd.s32 %v724_v19, %v720_v60  ;;  %v729_v24 = vadd.s32 %v725_v11, %v721_v54  ;;  %vm813_vm2 = vcmp.eq.s32.totalorder %v2762_v43, %v3306_v21  ;;  %vm814_vm3 = vcmp.eq.s32.totalorder %v2765_v2, %v3307_v22  ;;  %v3316_v54 = vld [vmem:[#allocation23_spill] sm:$0xff]  ;;  %v3318_v19 = vld [vmem:[#allocation24_spill] sm:$0xff] }
 0x764   :  { %v632_v25 = vcvt.s32.f32 %v630_v6  ;;  %v633_v4 = vcvt.s32.f32 %v631_v47  ;;  %vm815_vm4 = vcmp.eq.s32.totalorder %v2768_v0, %v3308_v41  ;;  %v730_v36 = vadd.s32 %v727_v61, %v726_v10  ;;  %v3319_v6 = vld [vmem:[#allocation50_spill] sm:$0xff]  ;;  %v3320_v47 = vld [vmem:[#allocation25_spill] sm:$0xff]  ;;  %v3321_v11 = vld [vmem:[#allocation51_spill] sm:$0xff] }
 0x765   :  { %v731_v16 = vadd.s32 %v729_v24, %v728_v18  ;;  %vm816_vm5 = vcmp.eq.s32.totalorder %v2776_v15, %v3309_v34  ;;  %vm817_vm6 = vcmp.eq.s32.totalorder %v2771_v1, %v3310_v37  ;;  %vm818_vm7 = vcmp.eq.s32.totalorder %v2779_v30, %v3311_v42 }
 0x766   :  { %634 = vadd.xlane.f32.xlu1 %v632_v25  ;;  %636 = vadd.xlane.f32.xlu0 %v633_v4  ;;  %vm819_vm8 = vcmp.eq.s32.totalorder %v2782_v31, %v3312_v14  ;;  %vm820_vm9 = vcmp.eq.s32.totalorder %v2786_v8, %v3313_v39  ;;  %v821_v23 = vsel %vm813_vm2, 1, %v3295_v17  ;;  %v822_v51 = vsel %vm814_vm3, 1, %v3295_v17  ;;  %v3322_v39 = vld [vmem:[#allocation52_spill] sm:$0xff] }
 0x767   :  { %v732_v55 = vadd.s32 %v731_v16, %v730_v36  ;;  %v823_v40 = vsel %vm815_vm4, 1, %v3295_v17  ;;  %v824_v35 = vsel %vm816_vm5, 1, %v3295_v17  ;;  %v825_v53 = vsel %vm817_vm6, 1, %v3295_v17 }
 0x768   :  { %v826_v58 = vsel %vm818_vm7, 1, %v3295_v17  ;;  %v827_v49 = vsel %vm819_vm8, 1, %v3295_v17  ;;  %v828_v52 = vsel %vm820_vm9, 1, %v3295_v17  ;;  %v829_v57 = vadd.s32 %v825_v53, %v821_v23  ;;  %v3323_v23 = vld [vmem:[#allocation28_spill] sm:$0xff]  ;;  %v3325_v53 = vld [vmem:[#allocation30_spill] sm:$0xff] }
 0x769   :  { %v734_v3 = vshrl.u32 %v732_v55, 16  ;;  %v733_v50 = vand.u32 65535, %v732_v55  ;;  %v830_v7 = vadd.s32 %v826_v58, %v822_v51  ;;  %v831_v20 = vadd.s32 %v827_v49, %v823_v40  ;;  %v3324_v55 = vld [vmem:[#allocation53_spill] sm:$0xff]  ;;  %v3326_v49 = vld [vmem:[#allocation31_spill] sm:$0xff] }
 0x76a   :  { %v832_v38 = vadd.s32 %v828_v52, %v824_v35  ;;  %vm916_vm10 = vcmp.eq.s32.totalorder %v2762_v43, %v3314_v59  ;;  %vm917_vm11 = vcmp.eq.s32.totalorder %v2765_v2, %v3315_v12  ;;  %vm918_vm12 = vcmp.eq.s32.totalorder %v2768_v0, %v3316_v54  ;;  %v3327_v52 = vld [vmem:[#allocation33_spill] sm:$0xff] }
 0x76b   :  { %v736_v27 = vcvt.s32.f32 %v734_v3  ;;  %v735_v62 = vcvt.s32.f32 %v733_v50  ;;  %v833_v60 = vadd.s32 %v830_v7, %v829_v57  ;;  %vm919_vm13 = vcmp.eq.s32.totalorder %v2776_v15, %v3317_v13 }
 0x76c   :  { %v834_v26 = vadd.s32 %v832_v38, %v831_v20  ;;  %vm920_vm14 = vcmp.eq.s32.totalorder %v2771_v1, %v3318_v19  ;;  %vm921_vm15 = vcmp.eq.s32.totalorder %v2779_v30, %v3319_v6  ;;  %vm922_vm0 = vcmp.eq.s32.totalorder %v2782_v31, %v3320_v47  ;;  %v3328_v19 = vld [vmem:[#allocation34_spill] sm:$0xff] }
 0x76d   :  { %739 = vadd.xlane.f32.xlu1 %v736_v27  ;;  %737 = vadd.xlane.f32.xlu0 %v735_v62  ;;  %vm923_vm1 = vcmp.eq.s32.totalorder %v2786_v8, %v3321_v11  ;;  %v924_v10 = vsel %vm916_vm10, 1, %v3295_v17  ;;  %v925_v61 = vsel %vm917_vm11, 1, %v3295_v17  ;;  %v926_v24 = vsel %vm918_vm12, 1, %v3295_v17 }
 0x76e   :  { %v835_v18 = vadd.s32 %v834_v26, %v833_v60  ;;  %v927_v21 = vsel %vm919_vm13, 1, %v3295_v17  ;;  %v928_v25 = vsel %vm920_vm14, 1, %v3295_v17  ;;  %v929_v4 = vsel %vm921_vm15, 1, %v3295_v17 }
 0x76f   :  { %v930_v22 = vsel %vm922_vm0, 1, %v3295_v17  ;;  %v931_v41 = vsel %vm923_vm1, 1, %v3295_v17  ;;  %v932_v36 = vadd.s32 %v928_v25, %v924_v10  ;;  %v933_v37 = vadd.s32 %v929_v4, %v925_v61  ;;  %v3329_v10 = vld [vmem:[#allocation35_spill] sm:$0xff]  ;;  %v3330_v61 = vld [vmem:[#allocation36_spill] sm:$0xff] }
 0x770   :  { %v836_v16 = vand.u32 65535, %v835_v18  ;;  %v837_v34 = vshrl.u32 %v835_v18, 16  ;;  %v934_v42 = vadd.s32 %v930_v22, %v926_v24  ;;  %v935_v14 = vadd.s32 %v931_v41, %v927_v21 }
 0x771   :  { %vm1019_vm2 = vcmp.eq.s32.totalorder %v2762_v43, %v3322_v39  ;;  %vm1020_vm3 = vcmp.eq.s32.totalorder %v2765_v2, %v3323_v23  ;;  %vm1021_vm4 = vcmp.eq.s32.totalorder %v2768_v0, %v3324_v55  ;;  %v936_v35 = vadd.s32 %v933_v37, %v932_v36  ;;  %v3331_v37 = vld [vmem:[#allocation60_spill] sm:$0xff]  ;;  %v3332_v39 = vld [vmem:[#allocation37_spill] sm:$0xff]  ;;  %v3333_v23 = vld [vmem:[#allocation62_spill] sm:$0xff] }
 0x772   :  { %v838_v51 = vcvt.s32.f32 %v836_v16  ;;  %v839_v40 = vcvt.s32.f32 %v837_v34  ;;  %vm1022_vm5 = vcmp.eq.s32.totalorder %v2776_v15, %v3325_v53  ;;  %v937_v58 = vadd.s32 %v935_v14, %v934_v42  ;;  %v3336_v53 = vld [vmem:[#allocation39_spill] sm:$0xff] }
 0x773   :  { %vm1023_vm6 = vcmp.eq.s32.totalorder %v2771_v1, %v2590_v48  ;;  %vm1024_vm7 = vcmp.eq.s32.totalorder %v2779_v30, %v3326_v49  ;;  %vm1025_vm8 = vcmp.eq.s32.totalorder %v2782_v31, %v2635_v44  ;;  %vm1026_vm9 = vcmp.eq.s32.totalorder %v2786_v8, %v3327_v52  ;;  %v3338_v49 = vld [vmem:[#allocation40_spill] sm:$0xff] }
 0x774   :  { %840 = vadd.xlane.f32.xlu1 %v838_v51  ;;  %842 = vadd.xlane.f32.xlu0 %v839_v40  ;;  %v1027_v3 = vsel %vm1019_vm2, 1, %v3295_v17  ;;  %v1028_v50 = vsel %vm1020_vm3, 1, %v3295_v17  ;;  %v1029_v57 = vsel %vm1021_vm4, 1, %v3295_v17  ;;  %v938_v7 = vadd.s32 %v937_v58, %v936_v35  ;;  %v3334_v40 = vld [vmem:[#allocation38_spill] sm:$0xff]  ;;  %v3335_v35 = vld [vmem:[#allocation64_spill] sm:$0xff] }
 0x775   :  { %v1030_v48 = vsel %vm1022_vm5, 1, %v3295_v17  ;;  %v1031_v20 = vsel %vm1023_vm6, 1, %v3295_v17  ;;  %v1032_v38 = vsel %vm1024_vm7, 1, %v3295_v17  ;;  %v1033_v44 = vsel %vm1025_vm8, 1, %v3295_v17  ;;  %v3337_v58 = vld [vmem:[#allocation66_spill] sm:$0xff] }
 0x776   :  { %v1034_v59 = vsel %vm1026_vm9, 1, %v3295_v17  ;;  %v1035_v12 = vadd.s32 %v1031_v20, %v1027_v3  ;;  %v1036_v27 = vadd.s32 %v1032_v38, %v1028_v50  ;;  %v940_v62 = vshrl.u32 %v938_v7, 16 }
 0x777   :  { %v939_v60 = vand.u32 65535, %v938_v7  ;;  %v1037_v54 = vadd.s32 %v1033_v44, %v1029_v57  ;;  %v1038_v26 = vadd.s32 %v1034_v59, %v1030_v48  ;;  %vm1122_vm10 = vcmp.eq.s32.totalorder %v2762_v43, %v2641_v63 }
 0x778   :  { %v1039_v13 = vadd.s32 %v1036_v27, %v1035_v12  ;;  %vm1123_vm11 = vcmp.eq.s32.totalorder %v2765_v2, %v2645_v45  ;;  %vm1124_vm12 = vcmp.eq.s32.totalorder %v2768_v0, %v3328_v19  ;;  %v942_v6 = vcvt.s32.f32 %v940_v62 }
 0x779   :  { %v941_v47 = vcvt.s32.f32 %v939_v60  ;;  %v1040_v11 = vadd.s32 %v1038_v26, %v1037_v54  ;;  %vm1125_vm13 = vcmp.eq.s32.totalorder %v2776_v15, %v2653_v5  ;;  %vm1126_vm14 = vcmp.eq.s32.totalorder %v2771_v1, %v3329_v10  ;;  %v3339_v26 = vld [vmem:[#allocation67_spill] sm:$0xff] }
 0x77a   :  { %vm1127_vm15 = vcmp.eq.s32.totalorder %v2779_v30, %v2659_v29  ;;  %vm1128_vm0 = vcmp.eq.s32.totalorder %v2782_v31, %v3330_v61  ;;  %vm1129_vm1 = vcmp.eq.s32.totalorder %v2786_v8, %v2665_v28  ;;  %945 = vadd.xlane.f32.xlu1 %v942_v6  ;;  %v1130_v45 = vsel %vm1122_vm10, 1, %v3295_v17  ;;  %v3342_v61 = vld [vmem:[#allocation54_spill] sm:$0xff] }
 0x77b   :  { %943 = vadd.xlane.f32.xlu0 %v941_v47  ;;  %v1041_v63 = vadd.s32 %v1040_v11, %v1039_v13  ;;  %v1131_v18 = vsel %vm1123_vm11, 1, %v3295_v17  ;;  %v1132_v5 = vsel %vm1124_vm12, 1, %v3295_v17  ;;  %v1133_v24 = vsel %vm1125_vm13, 1, %v3295_v17  ;;  %v3340_v13 = vld [vmem:[#allocation69_spill] sm:$0xff]  ;;  %v3341_v11 = vld [vmem:[#allocation71_spill] sm:$0xff] }
 0x77c   :  { %v1134_v21 = vsel %vm1126_vm14, 1, %v3295_v17  ;;  %v1135_v29 = vsel %vm1127_vm15, 1, %v3295_v17  ;;  %v1136_v25 = vsel %vm1128_vm0, 1, %v3295_v17  ;;  %v1137_v28 = vsel %vm1129_vm1, 1, %v3295_v17 }
 0x77d   :  { %v1042_v4 = vand.u32 65535, %v1041_v63  ;;  %v1043_v22 = vshrl.u32 %v1041_v63, 16  ;;  %v1138_v41 = vadd.s32 %v1134_v21, %v1130_v45  ;;  %v1139_v36 = vadd.s32 %v1135_v29, %v1131_v18  ;;  %v3343_v63 = vld [vmem:[#allocation73_spill] sm:$0xff]  ;;  %v3344_v45 = vld [vmem:[#allocation75_spill] sm:$0xff] }
 0x77e   :  { %v1140_v16 = vadd.s32 %v1136_v25, %v1132_v5  ;;  %v1141_v34 = vadd.s32 %v1137_v28, %v1133_v24  ;;  %vm1225_vm2 = vcmp.eq.s32.totalorder %v2762_v43, %v3331_v37  ;;  %vm1226_vm3 = vcmp.eq.s32.totalorder %v2765_v2, %v3332_v39  ;;  %v3345_v18 = vld [vmem:[#allocation77_spill] sm:$0xff]  ;;  %v3346_v5 = vld [vmem:[#allocation78_spill] sm:$0xff] }
 0x77f   :  { %v1044_v42 = vcvt.s32.f32 %v1042_v4  ;;  %v1045_v14 = vcvt.s32.f32 %v1043_v22  ;;  %vm1227_vm4 = vcmp.eq.s32.totalorder %v2768_v0, %v3333_v23  ;;  %v1142_v55 = vadd.s32 %v1139_v36, %v1138_v41  ;;  %v3347_v23 = vld [vmem:[#allocation83_spill] sm:$0xff] }
 0x780   :  { %v1143_v51 = vadd.s32 %v1141_v34, %v1140_v16  ;;  %vm1228_vm5 = vcmp.eq.s32.totalorder %v2776_v15, %v3334_v40  ;;  %vm1229_vm6 = vcmp.eq.s32.totalorder %v2771_v1, %v3335_v35  ;;  %vm1230_vm7 = vcmp.eq.s32.totalorder %v2779_v30, %v3336_v53 }
 0x781   :  { %1046 = vadd.xlane.f32.xlu1 %v1044_v42  ;;  %1048 = vadd.xlane.f32.xlu0 %v1045_v14  ;;  %vm1231_vm8 = vcmp.eq.s32.totalorder %v2782_v31, %v3337_v58  ;;  %vm1232_vm9 = vcmp.eq.s32.totalorder %v2786_v8, %v3338_v49  ;;  %v1233_v52 = vsel %vm1225_vm2, 1, %v3295_v17  ;;  %v1234_v50 = vsel %vm1226_vm3, 1, %v3295_v17  ;;  %v3350_v58 = vld [vmem:[#allocation63_spill] sm:$0xff] }
 0x782   :  { %v1144_v3 = vadd.s32 %v1143_v51, %v1142_v55  ;;  %v1235_v57 = vsel %vm1227_vm4, 1, %v3295_v17  ;;  %v1236_v7 = vsel %vm1228_vm5, 1, %v3295_v17  ;;  %v1237_v48 = vsel %vm1229_vm6, 1, %v3295_v17  ;;  %v3348_v55 = vld [vmem:[#allocation61_spill] sm:$0xff]  ;;  %v3349_v51 = vld [vmem:[#allocation84_spill] sm:$0xff] }
 0x783   :  { %v1238_v20 = vsel %vm1230_vm7, 1, %v3295_v17  ;;  %v1239_v38 = vsel %vm1231_vm8, 1, %v3295_v17  ;;  %v1240_v44 = vsel %vm1232_vm9, 1, %v3295_v17  ;;  %v1241_v27 = vadd.s32 %v1237_v48, %v1233_v52  ;;  %v3351_v52 = vld [vmem:[#allocation85_spill] sm:$0xff] }
 0x784   :  { %v1146_v59 = vshrl.u32 %v1144_v3, 16  ;;  %v1145_v12 = vand.u32 65535, %v1144_v3  ;;  %v1242_v62 = vadd.s32 %v1238_v20, %v1234_v50  ;;  %v1243_v60 = vadd.s32 %v1239_v38, %v1235_v57  ;;  %v3352_v3 = vld [vmem:[#allocation65_spill] sm:$0xff]  ;;  %v3353_v50 = vld [vmem:[#allocation86_spill] sm:$0xff]  ;;  %v3354_v57 = vld [vmem:[#allocation68_spill] sm:$0xff] }
 0x785   :  { %v1244_v54 = vadd.s32 %v1240_v44, %v1236_v7  ;;  %vm1328_vm10 = vcmp.eq.s32.totalorder %v2762_v43, %v3339_v26  ;;  %vm1329_vm11 = vcmp.eq.s32.totalorder %v2765_v2, %v3340_v13  ;;  %vm1330_vm12 = vcmp.eq.s32.totalorder %v2768_v0, %v3341_v11  ;;  %v3356_v11 = vld [vmem:[#allocation70_spill] sm:$0xff] }
 0x786   :  { %v1148_v19 = vcvt.s32.f32 %v1146_v59  ;;  %v1147_v6 = vcvt.s32.f32 %v1145_v12  ;;  %v1245_v47 = vadd.s32 %v1242_v62, %v1241_v27  ;;  %vm1331_vm13 = vcmp.eq.s32.totalorder %v2776_v15, %v3342_v61  ;;  %v3358_v61 = vld [vmem:[#allocation72_spill] sm:$0xff] }
 0x787   :  { %v1246_v10 = vadd.s32 %v1244_v54, %v1243_v60  ;;  %vm1332_vm14 = vcmp.eq.s32.totalorder %v2771_v1, %v3343_v63  ;;  %vm1333_vm15 = vcmp.eq.s32.totalorder %v2779_v30, %v3344_v45  ;;  %vm1334_vm0 = vcmp.eq.s32.totalorder %v2782_v31, %v3345_v18  ;;  %v3359_v18 = vld [vmem:[#allocation89_spill] sm:$0xff] }
 0x788   :  { %1151 = vadd.xlane.f32.xlu1 %v1148_v19  ;;  %1149 = vadd.xlane.f32.xlu0 %v1147_v6  ;;  %vm1335_vm1 = vcmp.eq.s32.totalorder %v2786_v8, %v3346_v5  ;;  %v1336_v24 = vsel %vm1328_vm10, 1, %v3295_v17  ;;  %v1337_v21 = vsel %vm1329_vm11, 1, %v3295_v17  ;;  %v1338_v25 = vsel %vm1330_vm12, 1, %v3295_v17  ;;  %v3355_v6 = vld [vmem:[#allocation87_spill] sm:$0xff]  ;;  %v3360_v5 = vld [vmem:[#allocation74_spill] sm:$0xff] }
 0x789   :  { %v1247_v29 = vadd.s32 %v1246_v10, %v1245_v47  ;;  %v1339_v4 = vsel %vm1331_vm13, 1, %v3295_v17  ;;  %v1340_v22 = vsel %vm1332_vm14, 1, %v3295_v17  ;;  %v1341_v28 = vsel %vm1333_vm15, 1, %v3295_v17  ;;  %v3357_v10 = vld [vmem:[#allocation88_spill] sm:$0xff] }
 0x78a   :  { %v1342_v41 = vsel %vm1334_vm0, 1, %v3295_v17  ;;  %v1343_v36 = vsel %vm1335_vm1, 1, %v3295_v17  ;;  %v1344_v16 = vadd.s32 %v1340_v22, %v1336_v24  ;;  %v1345_v42 = vadd.s32 %v1341_v28, %v1337_v21  ;;  %v3361_v24 = vld [vmem:[#allocation90_spill] sm:$0xff]  ;;  %v3362_v21 = vld [vmem:[#allocation76_spill] sm:$0xff] }
 0x78b   :  { %v1248_v34 = vand.u32 65535, %v1247_v29  ;;  %v1249_v37 = vshrl.u32 %v1247_v29, 16  ;;  %v1346_v14 = vadd.s32 %v1342_v41, %v1338_v25  ;;  %v1347_v39 = vadd.s32 %v1343_v36, %v1339_v4 }
 0x78c   :  { %vm1534_vm2 = vcmp.eq.s32.totalorder %v2762_v43, %v3347_v23  ;;  %vm1535_vm3 = vcmp.eq.s32.totalorder %v2765_v2, %v3348_v55  ;;  %vm1536_vm4 = vcmp.eq.s32.totalorder %v2768_v0, %v3349_v51  ;;  %v1348_v53 = vadd.s32 %v1345_v42, %v1344_v16 }
 0x78d   :  { %v1250_v40 = vcvt.s32.f32 %v1248_v34  ;;  %v1251_v35 = vcvt.s32.f32 %v1249_v37  ;;  %vm1537_vm5 = vcmp.eq.s32.totalorder %v2776_v15, %v3350_v58  ;;  %v1349_v49 = vadd.s32 %v1347_v39, %v1346_v14 }
 0x78e   :  { %vm1538_vm6 = vcmp.eq.s32.totalorder %v2771_v1, %v3351_v52  ;;  %vm1539_vm7 = vcmp.eq.s32.totalorder %v2779_v30, %v3352_v3  ;;  %vm1540_vm8 = vcmp.eq.s32.totalorder %v2782_v31, %v3353_v50  ;;  %vm1541_vm9 = vcmp.eq.s32.totalorder %v2786_v8, %v3354_v57  ;;  %v3363_v50 = vld [vmem:[#allocation14_spill] sm:$0xff]  ;;  %v3364_v57 = vld [vmem:[#allocation55_spill] sm:$0xff] }
 0x78f   :  { %1252 = vadd.xlane.f32.xlu1 %v1250_v40  ;;  %1254 = vadd.xlane.f32.xlu0 %v1251_v35  ;;  %v1542_v7 = vsel %vm1534_vm2, 1, %v3295_v17  ;;  %v1543_v48 = vsel %vm1535_vm3, 1, %v3295_v17  ;;  %v1544_v20 = vsel %vm1536_vm4, 1, %v3295_v17  ;;  %v3109_v38 = vadd.s32 %v1349_v49, %v1348_v53 }
 0x790   :  { %v1545_v44 = vsel %vm1537_vm5, 1, %v3295_v17  ;;  %v1546_v59 = vsel %vm1538_vm6, 1, %v3295_v17  ;;  %v1547_v12 = vsel %vm1539_vm7, 1, %v3295_v17  ;;  %v1548_v27 = vsel %vm1540_vm8, 1, %v3295_v17 }
 0x791   :  { %v1549_v62 = vsel %vm1541_vm9, 1, %v3295_v17  ;;  %v1550_v60 = vadd.s32 %v1546_v59, %v1542_v7  ;;  %v1551_v54 = vadd.s32 %v1547_v12, %v1543_v48  ;;  %v1352_v26 = vshrl.u32 %v3109_v38, 16  ;;  %v3369_v59 = vld [vmem:[#allocation56_spill] sm:$0xff] }
 0x792   :  { %v1552_v13 = vadd.s32 %v1548_v27, %v1544_v20  ;;  %v1553_v19 = vadd.s32 %v1549_v62, %v1545_v44  ;;  %vm1637_vm10 = vcmp.eq.s32.totalorder %v2762_v43, %v3355_v6  ;;  %vm1638_vm11 = vcmp.eq.s32.totalorder %v2765_v2, %v3356_v11  ;;  %v3365_v20 = vld [vmem:[#allocation59_spill] sm:$0xff]  ;;  %v3370_v12 = vld [vmem:[#allocation80_spill] sm:$0xff]  ;;  %v3371_v27 = vld [vmem:[#allocation81_spill] sm:$0xff] }
 0x793   :  { %v1554_v47 = vadd.s32 %v1551_v54, %v1550_v60  ;;  %vm1639_vm12 = vcmp.eq.s32.totalorder %v2768_v0, %v3357_v10  ;;  %vm1640_vm13 = vcmp.eq.s32.totalorder %v2776_v15, %v3358_v61  ;;  %v1354_v63 = vcvt.s32.f32 %v1352_v26  ;;  %v3372_v54 = vld [vmem:[#allocation79_spill] sm:$0xff] }
 0x794   :  { %v1555_v45 = vadd.s32 %v1553_v19, %v1552_v13  ;;  %vm1641_vm14 = vcmp.eq.s32.totalorder %v2771_v1, %v3359_v18  ;;  %vm1642_vm15 = vcmp.eq.s32.totalorder %v2779_v30, %v3360_v5  ;;  %vm1643_vm0 = vcmp.eq.s32.totalorder %v2782_v31, %v3361_v24 }
 0x795   :  { %vm1644_vm1 = vcmp.eq.s32.totalorder %v2786_v8, %v3362_v21  ;;  %v1645_v29 = vsel %vm1637_vm10, 1, %v3295_v17  ;;  %v1646_v25 = vsel %vm1638_vm11, 1, %v3295_v17  ;;  %1357 = vadd.xlane.f32.xlu1 %v1354_v63  ;;  %v1647_v22 = vsel %vm1639_vm12, 1, %v3295_v17 }
 0x796   :  { %v1556_v4 = vadd.s32 %v1555_v45, %v1554_v47  ;;  %v1648_v28 = vsel %vm1640_vm13, 1, %v3295_v17  ;;  %v1649_v41 = vsel %vm1641_vm14, 1, %v3295_v17  ;;  %v1650_v36 = vsel %vm1642_vm15, 1, %v3295_v17 }
 0x797   :  { %v1651_v16 = vsel %vm1643_vm0, 1, %v3295_v17  ;;  %v1652_v34 = vsel %vm1644_vm1, 1, %v3295_v17  ;;  %v1653_v37 = vadd.s32 %v1649_v41, %v1645_v29  ;;  %v1654_v14 = vadd.s32 %v1650_v36, %v1646_v25 }
 0x798   :  { %v1558_v42 = vshrl.u32 %v1556_v4, 16  ;;  %v1655_v39 = vadd.s32 %v1651_v16, %v1647_v22  ;;  %v1656_v23 = vadd.s32 %v1652_v34, %v1648_v28  ;;  %v1760_v55 = vadd.s32 %v2811_v9, %v2848_v33  ;;  %v3366_v9 = vld [vmem:[#allocation57_spill] sm:$0xff]  ;;  %v3367_v33 = vld [vmem:[#allocation58_spill] sm:$0xff]  ;;  %v3171_v16 = vpop.permute.xlu1 %1834 }
 0x799   :  { %v1657_v40 = vadd.s32 %v1654_v14, %v1653_v37  ;;  %v1839_v7 = vrot.slane %v3364_v57, %v3363_v50  ;;  %vm1438_vm2 = vcmp.eq.s32.totalorder %v2786_v8, %v3365_v20  ;;  %vm1434_vm3 = vcmp.eq.s32.totalorder %v2776_v15, %v3366_v9 }
 0x79a   :  { %v1560_v51 = vcvt.s32.f32 %v1558_v42  ;;  %v1658_v35 = vadd.s32 %v1656_v23, %v1655_v39  ;;  %v1762_v58 = vadd.s32 %v2850_v56, %v1760_v55  ;;  %vm1436_vm4 = vcmp.eq.s32.totalorder %v2779_v30, %v3367_v33  ;;  %v3368_v56 = vld [vmem:[#allocation82_spill] sm:$0xff] }
 0x79b   :  { %vm1437_vm5 = vcmp.eq.s32.totalorder %v2782_v31, %v3368_v56  ;;  %v1446_v44 = vsel %vm1438_vm2, 1, %v3295_v17  ;;  %vm1432_vm6 = vcmp.eq.s32.totalorder %v2765_v2, %v3369_v59  ;;  %vm1433_vm7 = vcmp.eq.s32.totalorder %v2768_v0, %v3370_v12 }
 0x79c   :  { %1563 = vadd.xlane.f32.xlu1 %v1560_v51  ;;  %v1659_v53 = vadd.s32 %v1658_v35, %v1657_v40  ;;  %v1764_v3 = vshrl.u32 %v1762_v58, 16  ;;  %vm1435_vm8 = vcmp.eq.s32.totalorder %v2771_v1, %v3371_v27  ;;  %v1442_v62 = vsel %vm1434_vm3, 1, %v3295_v17 }
 0x79d   :  { %v1444_v60 = vsel %vm1436_vm4, 1, %v3295_v17  ;;  %v1445_v30 = vsel %vm1437_vm5, 1, %v3295_v17  ;;  %vm1431_vm9 = vcmp.eq.s32.totalorder %v2762_v43, %v3372_v54  ;;  %v1450_v26 = vadd.s32 %v1446_v44, %v1442_v62 }
 0x79e   :  { %v1661_v49 = vshrl.u32 %v1659_v53, 16  ;;  %v1766_v48 = vcvt.s32.f32 %v1764_v3  ;;  %v1440_v13 = vsel %vm1432_vm6, 1, %v3295_v17  ;;  %v1441_v2 = vsel %vm1433_vm7, 1, %v3295_v17 }
 0x79f   :  { %v1443_v19 = vsel %vm1435_vm8, 1, %v3295_v17  ;;  %v1448_v6 = vadd.s32 %v1444_v60, %v1440_v13  ;;  %v1449_v47 = vadd.s32 %v1445_v30, %v1441_v2  ;;  %v1439_v1 = vsel %vm1431_vm9, 1, %v3295_v17 }
 0x7a0   :  { %v1663_v52 = vcvt.s32.f32 %v1661_v49  ;;  %v1447_v11 = vadd.s32 %v1443_v19, %v1439_v1  ;;  %v1351_v5 = vand.u32 65535, %v3109_v38  ;;  %v1557_v29 = vand.u32 65535, %v1556_v4 }
 0x7a1   :  { %v1452_v10 = vadd.s32 %v1450_v26, %v1449_v47  ;;  %v1660_v22 = vand.u32 65535, %v1659_v53  ;;  %v1763_v41 = vand.u32 65535, %v1762_v58  ;;  %vm1849_vm10 = vcmp.eq.s32.totalorder %v2782_v31, %v3171_v16 }
 0x7a2   :  { %1666 = vadd.xlane.f32.xlu1 %v1663_v52  ;;  %v1451_v61 = vadd.s32 %v1448_v6, %v1447_v11  ;;  %v1353_v43 = vcvt.s32.f32 %v1351_v5  ;;  %v1559_v25 = vcvt.s32.f32 %v1557_v29  ;;  %vm1845_vm11 = vcmp.eq.s32.totalorder %v2768_v0, %v2804_v46 }
 0x7a3   :  { %v1662_v28 = vcvt.s32.f32 %v1660_v22  ;;  %v1765_v36 = vcvt.s32.f32 %v1763_v41  ;;  %v1853_v31 = vsel %vm1845_vm11, 1, %v3295_v17 }
 0x7a4   :  { %v1453_v63 = vadd.s32 %v1452_v10, %v1451_v61 }
 0x7a5   :  { %1841 = vbcast.lane.b32.xlu0 %v1839_v7, 256 }
 0x7a6   :  { %1769 = vadd.xlane.f32.xlu1 %v1766_v48  ;;  %v1455_v45 = vshrl.u32 %v1453_v63, 16  ;;  %v1454_v24 = vand.u32 65535, %v1453_v63 }
 0x7a8   :  { %v1457_v18 = vcvt.s32.f32 %v1455_v45  ;;  %v1456_v21 = vcvt.s32.f32 %v1454_v24 }
 0x7c4   :  { %1460 = vadd.xlane.f32.xlu0 %v1457_v18 }
 0x7c8   :  { %1355 = vadd.xlane.f32.xlu0 %v1353_v43 }
 0x7cc   :  { %1458 = vadd.xlane.f32.xlu0 %v1456_v21 }
 0x7d0   :  { %1561 = vadd.xlane.f32.xlu0 %v1559_v25 }
 0x7d4   :  { %1664 = vadd.xlane.f32.xlu0 %v1662_v28 }
 0x7d8   :  { %1767 = vadd.xlane.f32.xlu0 %v1765_v36 }
 0x7df   :  { %v327_v34 = vpop.xlane.xlu0 %326  ;;  %v329_v37 = vpop.xlane.xlu1 %328 }
 0x7e0   :  { %v331_v38 = vcvt.f32.s32 %v329_v37  ;;  %v330_v42 = vcvt.f32.s32 %v327_v34 }
 0x7e2   :  { %v332_v14 = vshll.u32 %v331_v38, 16 }
 0x7e4   :  { %v333_v39 = vadd.s32 %v332_v14, %v330_v42 }
 0x7e6   :  { %v334_v23 = vrot.slane %v333_v39, 4  ;;  %v431_v55 = vpop.xlane.xlu0 %430  ;;  %v429_v4 = vpop.xlane.xlu1 %428 }
 0x7e7   :  { %v433_v51 = vcvt.f32.s32 %v431_v55  ;;  %v432_v53 = vcvt.f32.s32 %v429_v4 }
 0x7e8   :  { %v335_v40 = vadd.s32 %v334_v23, %v333_v39 }
 0x7e9   :  { %v434_v35 = vshll.u32 %v433_v51, 16 }
 0x7ea   :  { %v336_v49 = vrot.slane %v335_v40, 2 }
 0x7eb   :  { %v435_v58 = vadd.s32 %v434_v35, %v432_v53 }
 0x7ec   :  { %v337_v52 = vadd.s32 %v336_v49, %v335_v40  ;;  %v534_v57 = vpop.xlane.xlu1 %533 }
 0x7ed   :  { %v436_v3 = vrot.slane %v435_v58, 4  ;;  %v532_v50 = vpop.xlane.xlu0 %531  ;;  %v536_v7 = vcvt.f32.s32 %v534_v57 }
 0x7ee   :  { %v338_v48 = vrot.slane %v337_v52, 1  ;;  %v535_v9 = vcvt.f32.s32 %v532_v50 }
 0x7ef   :  { %v437_v20 = vadd.s32 %v436_v3, %v435_v58  ;;  %v537_v33 = vshll.u32 %v536_v7, 16 }
 0x7f0   :  { %v339_v56 = vadd.s32 %v338_v48, %v337_v52 }
 0x7f1   :  { %v438_v44 = vrot.slane %v437_v20, 2  ;;  %v538_v59 = vadd.s32 %v537_v33, %v535_v9 }
 0x7f2   :  { %1930 = vpush %v339_v56 }
 0x7f3   :  { %v637_v12 = vpop.xlane.xlu0 %636  ;;  %v635_v27 = vpop.xlane.xlu1 %634  ;;  %v439_v62 = vadd.s32 %v438_v44, %v437_v20  ;;  %v539_v60 = vrot.slane %v538_v59, 4 }
 0x7f4   :  { %v639_v30 = vcvt.f32.s32 %v637_v12  ;;  %v638_v2 = vcvt.f32.s32 %v635_v27 }
 0x7f5   :  { %v440_v54 = vrot.slane %v439_v62, 1  ;;  %v540_v26 = vadd.s32 %v539_v60, %v538_v59 }
 0x7f6   :  { %v640_v13 = vshll.u32 %v639_v30, 16 }
 0x7f7   :  { %v441_v19 = vadd.s32 %v440_v54, %v439_v62  ;;  %v541_v47 = vrot.slane %v540_v26, 2 }
 0x7f8   :  { %v641_v6 = vadd.s32 %v640_v13, %v638_v2 }
 0x7f9   :  { %1932 = vpush %v441_v19  ;;  %v542_v61 = vadd.s32 %v541_v47, %v540_v26 }
 0x7fa   :  { %v642_v1 = vrot.slane %v641_v6, 4  ;;  %v738_v11 = vpop.xlane.xlu0 %737  ;;  %v740_v10 = vpop.xlane.xlu1 %739 }
 0x7fb   :  { %v742_v63 = vcvt.f32.s32 %v740_v10  ;;  %v543_v18 = vrot.slane %v542_v61, 1  ;;  %v741_v5 = vcvt.f32.s32 %v738_v11 }
 0x7fc   :  { %v643_v45 = vadd.s32 %v642_v1, %v641_v6 }
 0x7fd   :  { %v743_v43 = vshll.u32 %v742_v63, 16  ;;  %v544_v24 = vadd.s32 %v543_v18, %v542_v61 }
 0x7fe   :  { %v644_v21 = vrot.slane %v643_v45, 2 }
 0x7ff   :  { %v744_v29 = vadd.s32 %v743_v43, %v741_v5  ;;  %1934 = vpush %v544_v24 }
 0x800   :  { %v645_v25 = vadd.s32 %v644_v21, %v643_v45 }
 0x801   :  { %v745_v22 = vrot.slane %v744_v29, 4  ;;  %v843_v28 = vpop.xlane.xlu0 %842  ;;  %v841_v41 = vpop.xlane.xlu1 %840 }
 0x802   :  { %v845_v36 = vcvt.f32.s32 %v843_v28  ;;  %v646_v34 = vrot.slane %v645_v25, 1  ;;  %v844_v42 = vcvt.f32.s32 %v841_v41  ;;  %v1857_v41 = vsel %vm1849_vm10, 1, %v3295_v17 }
 0x803   :  { %v746_v37 = vadd.s32 %v745_v22, %v744_v29  ;;  %v3373_v22 = vld [vmem:[#allocation91_spill] sm:$0xff] }
 0x804   :  { %v846_v38 = vshll.u32 %v845_v36, 16  ;;  %v647_v14 = vadd.s32 %v646_v34, %v645_v25  ;;  %vm1846_vm12 = vcmp.eq.s32.totalorder %v2776_v15, %v3373_v22 }
 0x805   :  { %v747_v39 = vrot.slane %v746_v37, 2  ;;  %v1854_v16 = vsel %vm1846_vm12, 1, %v3295_v17 }
 0x806   :  { %v847_v23 = vadd.s32 %v846_v38, %v844_v42  ;;  %1936 = vpush %v647_v14  ;;  %v1861_v38 = vadd.s32 %v1857_v41, %v1853_v31 }
 0x807   :  { %v748_v55 = vadd.s32 %v747_v39, %v746_v37  ;;  %v946_v40 = vpop.xlane.xlu1 %945 }
 0x808   :  { %v848_v4 = vrot.slane %v847_v23, 4  ;;  %v944_v51 = vpop.xlane.xlu0 %943  ;;  %v948_v35 = vcvt.f32.s32 %v946_v40 }
 0x809   :  { %v749_v53 = vrot.slane %v748_v55, 1  ;;  %v947_v58 = vcvt.f32.s32 %v944_v51 }
 0x80a   :  { %v849_v49 = vadd.s32 %v848_v4, %v847_v23  ;;  %v949_v52 = vshll.u32 %v948_v35, 16 }
 0x80b   :  { %v750_v3 = vadd.s32 %v749_v53, %v748_v55 }
 0x80c   :  { %v850_v50 = vrot.slane %v849_v49, 2  ;;  %v950_v57 = vadd.s32 %v949_v52, %v947_v58 }
 0x80d   :  { %1938 = vpush %v750_v3 }
 0x80e   :  { %v1049_v7 = vpop.xlane.xlu0 %1048  ;;  %v1047_v48 = vpop.xlane.xlu1 %1046  ;;  %v851_v20 = vadd.s32 %v850_v50, %v849_v49  ;;  %v951_v9 = vrot.slane %v950_v57, 4 }
 0x80f   :  { %v1051_v33 = vcvt.f32.s32 %v1049_v7  ;;  %v1050_v12 = vcvt.f32.s32 %v1047_v48 }
 0x810   :  { %v852_v56 = vrot.slane %v851_v20, 1  ;;  %v952_v44 = vadd.s32 %v951_v9, %v950_v57 }
 0x811   :  { %v1052_v59 = vshll.u32 %v1051_v33, 16 }
 0x812   :  { %v853_v27 = vadd.s32 %v852_v56, %v851_v20  ;;  %v953_v60 = vrot.slane %v952_v44, 2 }
 0x813   :  { %v1053_v62 = vadd.s32 %v1052_v59, %v1050_v12 }
 0x814   :  { %1940 = vpush %v853_v27  ;;  %v954_v13 = vadd.s32 %v953_v60, %v952_v44 }
 0x815   :  { %v1054_v30 = vrot.slane %v1053_v62, 4  ;;  %v1150_v54 = vpop.xlane.xlu0 %1149  ;;  %v1152_v26 = vpop.xlane.xlu1 %1151 }
 0x816   :  { %v1154_v2 = vcvt.f32.s32 %v1152_v26  ;;  %v955_v6 = vrot.slane %v954_v13, 1  ;;  %v1153_v47 = vcvt.f32.s32 %v1150_v54 }
 0x817   :  { %v1055_v19 = vadd.s32 %v1054_v30, %v1053_v62 }
 0x818   :  { %v1155_v1 = vshll.u32 %v1154_v2, 16  ;;  %v956_v11 = vadd.s32 %v955_v6, %v954_v13 }
 0x819   :  { %v1056_v10 = vrot.slane %v1055_v19, 2 }
 0x81a   :  { %v1156_v61 = vadd.s32 %v1155_v1, %v1153_v47  ;;  %1942 = vpush %v956_v11 }
 0x81b   :  { %v1057_v63 = vadd.s32 %v1056_v10, %v1055_v19 }
 0x81c   :  { %v1157_v45 = vrot.slane %v1156_v61, 4  ;;  %v1255_v18 = vpop.xlane.xlu0 %1254  ;;  %v1253_v5 = vpop.xlane.xlu1 %1252 }
 0x81d   :  { %v1257_v43 = vcvt.f32.s32 %v1255_v18  ;;  %v1058_v24 = vrot.slane %v1057_v63, 1  ;;  %v1256_v25 = vcvt.f32.s32 %v1253_v5 }
 0x81e   :  { %v1158_v21 = vadd.s32 %v1157_v45, %v1156_v61 }
 0x81f   :  { %v1258_v29 = vshll.u32 %v1257_v43, 16  ;;  %v1059_v28 = vadd.s32 %v1058_v24, %v1057_v63 }
 0x820   :  { %v1842_v36 = vpop.permute.xlu0 %1841  ;;  %v1159_v34 = vrot.slane %v1158_v21, 2 }
 0x821   :  { %v1259_v37 = vadd.s32 %v1258_v29, %v1256_v25  ;;  %vm1850_vm13 = vcmp.eq.s32.totalorder %v2786_v8, %v1842_v36  ;;  %1944 = vpush %v1059_v28 }
 0x822   :  { %v1858_v0 = vsel %vm1850_vm13, 1, %v3295_v17  ;;  %v1160_v46 = vadd.s32 %v1159_v34, %v1158_v21  ;;  %v1358_v52 = vpop.xlane.xlu1 %1357 }
 0x823   :  { %v1260_v42 = vrot.slane %v1259_v37, 4  ;;  %v1862_v14 = vadd.s32 %v1858_v0, %v1854_v16  ;;  %v1360_v50 = vcvt.f32.s32 %v1358_v52 }
 0x824   :  { %v1161_v15 = vrot.slane %v1160_v46, 1 }
 0x825   :  { %v1261_v39 = vadd.s32 %v1260_v42, %v1259_v37  ;;  %v1864_v23 = vadd.s32 %v1862_v14, %v1861_v38  ;;  %v1361_v48 = vshll.u32 %v1360_v50, 16 }
 0x826   :  { %v1162_v55 = vadd.s32 %v1161_v15, %v1160_v46 }
 0x827   :  { %v1865_v4 = vadd.s32 %v1864_v23, %v2844_v32  ;;  %v1262_v51 = vrot.slane %v1261_v39, 2 }
 0x828   :  { %1946 = vpush %v1162_v55 }
 0x829   :  { %v1867_v8 = vshrl.u32 %v1865_v4, 16  ;;  %v1263_v40 = vadd.s32 %v1262_v51, %v1261_v39  ;;  %v1866_v49 = vand.u32 65535, %v1865_v4  ;;  %v1564_v57 = vpop.xlane.xlu1 %1563 }
 0x82a   :  { %v1566_v44 = vcvt.f32.s32 %v1564_v57 }
 0x82b   :  { %v1869_v35 = vcvt.s32.f32 %v1867_v8  ;;  %v1264_v53 = vrot.slane %v1263_v40, 1  ;;  %v1868_v17 = vcvt.s32.f32 %v1866_v49 }
 0x82c   :  { %v1567_v26 = vshll.u32 %v1566_v44, 16 }
 0x82d   :  { %1872 = vadd.xlane.f32.xlu1 %v1869_v35  ;;  %v1265_v58 = vadd.s32 %v1264_v53, %v1263_v40 }
 0x82f   :  { %1948 = vpush %v1265_v58  ;;  %v1667_v9 = vpop.xlane.xlu1 %1666 }
 0x830   :  { %v1669_v30 = vcvt.f32.s32 %v1667_v9 }
 0x831   :  { %1870 = vadd.xlane.f32.xlu1 %v1868_v17 }
 0x832   :  { %v1670_v10 = vshll.u32 %v1669_v30, 16 }
 0x833   :  { %v1770_v13 = vpop.xlane.xlu1 %1769 }
 0x834   :  { %v1772_v61 = vcvt.f32.s32 %v1770_v13 }
 0x836   :  { %v1773_v22 = vshll.u32 %v1772_v61, 16 }
 0x851   :  { %v1461_v3 = vpop.xlane.xlu0 %1460 }
 0x852   :  { %v1463_v20 = vcvt.f32.s32 %v1461_v3 }
 0x854   :  { %v1464_v59 = vshll.u32 %v1463_v20, 16 }
 0x855   :  { %v1356_v7 = vpop.xlane.xlu0 %1355 }
 0x856   :  { %v1359_v32 = vcvt.f32.s32 %v1356_v7 }
 0x858   :  { %v1362_v33 = vadd.s32 %v1361_v48, %v1359_v32 }
 0x859   :  { %v1459_v56 = vpop.xlane.xlu0 %1458 }
 0x85a   :  { %v1363_v12 = vrot.slane %v1362_v33, 4  ;;  %v1462_v27 = vcvt.f32.s32 %v1459_v56 }
 0x85c   :  { %v1364_v62 = vadd.s32 %v1363_v12, %v1362_v33  ;;  %v1465_v60 = vadd.s32 %v1464_v59, %v1462_v27 }
 0x85d   :  { %v1562_v54 = vpop.xlane.xlu0 %1561 }
 0x85e   :  { %v1466_v2 = vrot.slane %v1465_v60, 4  ;;  %v1565_v19 = vcvt.f32.s32 %v1562_v54  ;;  %v1365_v6 = vrot.slane %v1364_v62, 2 }
 0x860   :  { %v1467_v47 = vadd.s32 %v1466_v2, %v1465_v60  ;;  %v1568_v1 = vadd.s32 %v1567_v26, %v1565_v19  ;;  %v1366_v11 = vadd.s32 %v1365_v6, %v1364_v62 }
 0x861   :  { %v1665_v63 = vpop.xlane.xlu0 %1664 }
 0x862   :  { %v1569_v45 = vrot.slane %v1568_v1, 4  ;;  %v1668_v18 = vcvt.f32.s32 %v1665_v63  ;;  %v1367_v5 = vrot.slane %v1366_v11, 1  ;;  %v1468_v43 = vrot.slane %v1467_v47, 2 }
 0x864   :  { %v1570_v24 = vadd.s32 %v1569_v45, %v1568_v1  ;;  %v1671_v21 = vadd.s32 %v1670_v10, %v1668_v18  ;;  %v1368_v29 = vadd.s32 %v1367_v5, %v1366_v11  ;;  %v1469_v25 = vadd.s32 %v1468_v43, %v1467_v47 }
 0x865   :  { %v1768_v28 = vpop.xlane.xlu0 %1767 }
 0x866   :  { %v1672_v41 = vrot.slane %v1671_v21, 4  ;;  %v1771_v36 = vcvt.f32.s32 %v1768_v28  ;;  %1950 = vpush %v1368_v29  ;;  %v1470_v34 = vrot.slane %v1469_v25, 1  ;;  %v1571_v37 = vrot.slane %v1570_v24, 2 }
 0x868   :  { %v1673_v31 = vadd.s32 %v1672_v41, %v1671_v21  ;;  %v1774_v16 = vadd.s32 %v1773_v22, %v1771_v36  ;;  %v1471_v0 = vadd.s32 %v1470_v34, %v1469_v25  ;;  %v1572_v46 = vadd.s32 %v1571_v37, %v1570_v24 }
 0x86a   :  { %v1775_v38 = vrot.slane %v1774_v16, 4  ;;  %1952 = vpush %v1471_v0  ;;  %v1573_v42 = vrot.slane %v1572_v46, 1  ;;  %v1674_v14 = vrot.slane %v1673_v31, 2 }
 0x86c   :  { %v1776_v15 = vadd.s32 %v1775_v38, %v1774_v16  ;;  %v1574_v39 = vadd.s32 %v1573_v42, %v1572_v46  ;;  %v1675_v23 = vadd.s32 %v1674_v14, %v1673_v31 }
 0x86e   :  { %1954 = vpush %v1574_v39  ;;  %v1676_v55 = vrot.slane %v1675_v23, 1  ;;  %v1777_v4 = vrot.slane %v1776_v15, 2 }
 0x870   :  { %v1677_v51 = vadd.s32 %v1676_v55, %v1675_v23  ;;  %v1778_v8 = vadd.s32 %v1777_v4, %v1776_v15 }
 0x872   :  { %1956 = vpush %v1677_v51  ;;  %v1779_v40 = vrot.slane %v1778_v8, 1 }
 0x874   :  { %v1780_v35 = vadd.s32 %v1779_v40, %v1778_v8 }
 0x876   :  { %1958 = vpush %v1780_v35 }
 0x877   :  { %2045 = shalt.err (!%p2042_p6)
}
 0x878   :  { %s2046_s0 = scalar_lea.hbm %s3212_s3, 128 }
 0x879   :  { %p2047_p7 = scmp.ne.s32.totalorder %s3212_s3, %s2046_s0  ;;  %p2050_p8 = scmp.lt.u32.totalorder %s2046_s0, %s3212_s3 }
 0x87b   :  { %p2052_p9 = pnand %p2050_p8, %p2047_p7 }
 0x87d   :  { %2055 = shalt.err (!%p2052_p9)
}
 0x87e   :  { %1909 = dma.vmem_to_hbm [thread:$0]  %s1907_s30, 128, %s3212_s3, [#allocation9]  }
 0x87f   :  { %s1931_s12 = spop %1930  ;;  %s2112_s10 = smov [#allocation7]  }
 0x880   :  { %s1933_s13 = spop %1932  ;;  %s1896_s1 = sshll.u32 %s2112_s10, 4  ;;  %s1897_s1 = int_to_ptr.vmem [resolvable:$true] %s1896_s1 }
 0x881   :  { %s1935_s14 = spop %1934  ;;  %s443_s16 = sadd.s32 %s1933_s13, %s1931_s12 }
 0x882   :  { %s1937_s15 = spop %1936  ;;  %s546_s3 = sadd.s32 %s1935_s14, %s443_s16 }
 0x883   :  { %s1939_s17 = spop %1938  ;;  %s649_s19 = sadd.s32 %s1937_s15, %s546_s3 }
 0x884   :  { %s1941_s18 = spop %1940  ;;  %s752_s21 = sadd.s32 %s1939_s17, %s649_s19 }
 0x885   :  { %s1943_s20 = spop %1942  ;;  %s855_s23 = sadd.s32 %s1941_s18, %s752_s21 }
 0x886   :  { %s1945_s22 = spop %1944  ;;  %s958_s25 = sadd.s32 %s1943_s20, %s855_s23 }
 0x887   :  { %s1947_s24 = spop %1946  ;;  %s1061_s27 = sadd.s32 %s1945_s22, %s958_s25 }
 0x888   :  { %s1949_s26 = spop %1948  ;;  %s1164_s28 = sadd.s32 %s1947_s24, %s1061_s27 }
 0x889   :  { %s1267_s30 = sadd.s32 %s1949_s26, %s1164_s28  ;;  %s2056_s15 = scalar_lea.vmem %s1897_s1, 128 }
 0x88a   :  { %p2057_p10 = scmp.ne.s32.totalorder %s1897_s1, %s2056_s15  ;;  %p2061_p11 = scmp.lt.s32.totalorder %s1897_s1, %s1897_s1 }
 0x88b   :  { %p2062_p12 = scmp.lt.s32.totalorder %s2056_s15, %s2056_s15 }
 0x88d   :  { %p2063_p13 = por %p2062_p12, %p2061_p11 }
 0x88f   :  { %p2064_p0 = pnand %p2063_p13, %p2057_p10 }
 0x897   :  { %s1951_s29 = spop %1950 }
 0x898   :  { %s1370_s6 = sadd.s32 %s1951_s29, %s1267_s30 }
 0x89b   :  { %s1953_s4 = spop %1952 }
 0x89c   :  { %s1473_s7 = sadd.s32 %s1953_s4, %s1370_s6 }
 0x89f   :  { %s1955_s5 = spop %1954 }
 0x8a0   :  { %s1576_s9 = sadd.s32 %s1955_s5, %s1473_s7 }
 0x8a3   :  { %s1957_s0 = spop %1956 }
 0x8a4   :  { %s1679_s11 = sadd.s32 %s1957_s0, %s1576_s9 }
 0x8a7   :  { %s1959_s8 = spop %1958 }
 0x8a8   :  { %s1782_s12 = sadd.s32 %s1959_s8, %s1679_s11 }
 0x8ba   :  { %v1873_v53 = vpop.xlane.xlu1 %1872 }
 0x8bb   :  { %v1875_v49 = vcvt.f32.s32 %v1873_v53 }
 0x8bd   :  { %v1876_v17 = vshll.u32 %v1875_v49, 16 }
 0x8be   :  { %v1871_v58 = vpop.xlane.xlu1 %1870 }
 0x8bf   :  { %v1874_v52 = vcvt.f32.s32 %v1871_v58 }
 0x8c1   :  { %v1877_v3 = vadd.s32 %v1876_v17, %v1874_v52 }
 0x8c3   :  { %v1878_v50 = vrot.slane %v1877_v3, 4 }
 0x8c5   :  { %v1879_v57 = vadd.s32 %v1878_v50, %v1877_v3 }
 0x8c7   :  { %v1880_v7 = vrot.slane %v1879_v57, 2 }
 0x8c9   :  { %v1881_v48 = vadd.s32 %v1880_v7, %v1879_v57 }
 0x8cb   :  { %v1882_v20 = vrot.slane %v1881_v48, 1 }
 0x8cd   :  { %v1883_v32 = vadd.s32 %v1882_v20, %v1881_v48 }
 0x8cf   :  { %1960 = vpush %v1883_v32 }
 0x900   :  { %s1961_s13 = spop %1960 }
 0x901   :  { %s1885_s14 = sadd.s32 %s1961_s13, %s1782_s12 }
 0x902   :  { %v1886_v9 = vstv %s1885_s14 }
 0x903   :  { %1887 = vst [vmem:[#allocation7] sm:$0xff] %v1886_v9 }
 0x904   :  { %2067 = shalt.err (!%p2064_p0)
}
 0x905   :  { %s2068_s3 = scalar_lea.hbm %s3211_s2, 128 }
 0x906   :  { %p2069_p1 = scmp.ne.s32.totalorder %s3211_s2, %s2068_s3  ;;  %p2072_p2 = scmp.lt.u32.totalorder %s2068_s3, %s3211_s2 }
 0x908   :  { %p2074_p3 = pnand %p2072_p2, %p2069_p1 }
 0x90a   :  { %2077 = shalt.err (!%p2074_p3)
}
 0x90b   :  { %1899 = dma.vmem_to_hbm [thread:$0]  %s1897_s1, 128, %s3211_s2, [#allocation4]  }
 0x90c   :  { %2082 = dma.done.wait [#allocation4], 128  }
 0x90d   :  { %2083 = vsyncadd [#allocation4], 4294967168 }
 0x90e   :  { %2084 = dma.done.wait [#allocation9], 128  }
 0x90f   :  { %2085 = vsyncadd [#allocation9], 4294967168 }
 0x910   :  { %1916 = vsyncpa [#allocation3], 1 }
 0x911   :  { %1917 = vsyncpa [#allocation6], 1 }
 0x912   :  { %1918 = vsyncpa [#allocation4], 1 }
 0x913   :  { %1919 = vsyncpa [#allocation9], 1 }

</bundles_post_ra>
